<compile_context>
chip_gen: v6e
topology: v6e:2x2x1
jax: 0.10.0
libtpu: 0.0.40
codegen_flags: <defaults>
</compile_context>

<pallas_src>
import functools

import jax
import jax.numpy as jnp
from jax.experimental import pallas as pl
from jax.experimental.pallas import tpu as pltpu


LANE = 128            # TPU lane width (lane-dense output slabs / padding)
_EPS2 = 1e-24         # (1e-12)**2 : matches F.normalize's clamp on ||x||


def _round_up(n, m):
    return ((n + m - 1) // m) * m


def _pad_cols(a, to):
    pad = to - a.shape[-1]
    return a if pad == 0 else jnp.pad(a, [(0, 0)] * (a.ndim - 1) + [(0, pad)])


def _pad_rows(a, to):
    pad = to - a.shape[0]
    return a if pad == 0 else jnp.pad(a, [(0, pad)] + [(0, 0)] * (a.ndim - 1))


# ----------------------------------------------------------------------------
# Fused train kernel: one grid step == one (student view i, teacher view i)
# pair.  All weights are VMEM-resident (constant index_map); inputs are the
# per-view pixel matrices.  Output: per-view partial of the SimSiam loss,
# broadcast into a lane-dense (1, 8, 128) slab (summed outside).
# ----------------------------------------------------------------------------
def _train_view_kernel(xs_ref, xt_ref, pool_ref,
                       sew_ref, seb_ref, spw_ref, spb_ref, pdw_ref, pdb_ref,
                       tew_ref, teb_ref, tpw_ref, tpb_ref,
                       o_ref, *, inv_nk):
    xs = xs_ref[0]               # (B*P, C)  student pixels for this view
    xt = xt_ref[0]               # (B*P, C)  teacher pixels for this view
    pool = pool_ref[...]         # (B, B*P)  rows of 1/P -> spatial mean as matmul

    # ---- student: encoder (1x1 conv + ReLU + avg pool) -> projector -> predictor
    h = jnp.dot(xs, sew_ref[...], preferred_element_type=jnp.float32) + seb_ref[...]
    h = jnp.maximum(h, 0.0)                                         # (B*P, F)
    feat = jnp.dot(pool, h, preferred_element_type=jnp.float32)     # (B, F)
    proj = jnp.dot(feat, spw_ref[...], preferred_element_type=jnp.float32) + spb_ref[...]
    proj = jnp.maximum(proj, 0.0)                                   # (B, D)
    pred = jnp.dot(proj, pdw_ref[...], preferred_element_type=jnp.float32) + pdb_ref[...]

    # ---- teacher (frozen): encoder -> projector
    ht = jnp.dot(xt, tew_ref[...], preferred_element_type=jnp.float32) + teb_ref[...]
    ht = jnp.maximum(ht, 0.0)
    featt = jnp.dot(pool, ht, preferred_element_type=jnp.float32)
    gt = jnp.dot(featt, tpw_ref[...], preferred_element_type=jnp.float32) + tpb_ref[...]

    # ---- negative cosine similarity (rsqrt -> EUP; no sqrt/divide)
    pn = pred * jax.lax.rsqrt(
        jnp.maximum(jnp.sum(pred * pred, axis=-1, keepdims=True), _EPS2))
    zn = gt * jax.lax.rsqrt(
        jnp.maximum(jnp.sum(gt * gt, axis=-1, keepdims=True), _EPS2))
    cos = jnp.sum(pn * zn, axis=-1, keepdims=True)                  # (B, 1)
    partial = -jnp.sum(cos, axis=0, keepdims=True) * inv_nk         # (1, 1)

    # lane-dense full-tile store; wrapper reads element [i, 0, 0]
    o_ref[...] = jnp.broadcast_to(partial, o_ref.shape)


def _train_loss(params, x_stu, x_tea, pool, n, k):
    _, M, C = x_stu.shape
    B = pool.shape[0]

    view_block = lambda i: (i, 0, 0)
    const2 = lambda i: (0, 0)

    args = (
        x_stu, x_tea, pool,
        params["stu_enc"]["w"], params["stu_enc"]["b"],
        params["stu_proj"]["w"], params["stu_proj"]["b"],
        params["stu_pred"]["w"], params["stu_pred"]["b"],
        params["tea_enc"]["w"], params["tea_enc"]["b"],
        params["tea_proj"]["w"], params["tea_proj"]["b"],
    )
    in_specs = [
        pl.BlockSpec((1, M, C), view_block),     # student pixels, view i
        pl.BlockSpec((1, M, C), view_block),     # teacher pixels, view i
        pl.BlockSpec((B, M), const2),            # pooling matrix (resident)
    ] + [pl.BlockSpec(a.shape, const2) for a in args[3:]]  # weights resident

    partials = pl.pallas_call(
        functools.partial(_train_view_kernel, inv_nk=1.0 / float(n * k)),
        out_shape=jax.ShapeDtypeStruct((k, 8, LANE), jnp.float32),
        grid=(k,),
        in_specs=in_specs,
        out_specs=pl.BlockSpec((1, 8, LANE), view_block),
        compiler_params=pltpu.CompilerParams(
            dimension_semantics=("parallel",)),   # v7x: views shard over 2 TCs
    )(*args)
    return jnp.sum(partials[:, 0, 0])


# ----------------------------------------------------------------------------
# Fused kernels for the 'feat' and 'embs' inference modes (weights padded to
# 128 output lanes in the wrapper so all stores are unmasked full-lane).
# ----------------------------------------------------------------------------
def _encoder_kernel(x_ref, pool_ref, w_ref, b_ref, o_ref):
    h = jnp.dot(x_ref[...], w_ref[...], preferred_element_type=jnp.float32) + b_ref[...]
    h = jnp.maximum(h, 0.0)
    o_ref[...] = jnp.dot(pool_ref[...], h, preferred_element_type=jnp.float32)


def _embs_kernel(x_ref, pool_ref, ew_ref, eb_ref, pw_ref, pb_ref, dw_ref, db_ref,
                 feat_ref, proj_ref, pred_ref):
    h = jnp.dot(x_ref[...], ew_ref[...], preferred_element_type=jnp.float32) + eb_ref[...]
    h = jnp.maximum(h, 0.0)
    feat = jnp.dot(pool_ref[...], h, preferred_element_type=jnp.float32)
    proj = jnp.dot(feat, pw_ref[...], preferred_element_type=jnp.float32) + pb_ref[...]
    proj = jnp.maximum(proj, 0.0)
    pred = jnp.dot(proj, dw_ref[...], preferred_element_type=jnp.float32) + db_ref[...]
    feat_ref[...] = feat
    proj_ref[...] = proj
    pred_ref[...] = pred


def _pixels_and_pool(x_nchw):
    B, C, H, W = x_nchw.shape
    P = H * W
    xm = jnp.transpose(x_nchw, (0, 2, 3, 1)).reshape(B * P, C)     # (B*P, C)
    pool = jnp.repeat(jnp.eye(B, dtype=jnp.float32), P, axis=1) / float(P)
    return xm, pool


def _feat_forward(params, x):
    xm, pool = _pixels_and_pool(x)
    B = pool.shape[0]
    F = params["stu_enc"]["w"].shape[1]
    Fp = max(LANE, _round_up(F, LANE))
    w = _pad_cols(params["stu_enc"]["w"], Fp)
    b = _pad_cols(params["stu_enc"]["b"], Fp)

    const2 = lambda i: (0, 0)
    feat_p = pl.pallas_call(
        _encoder_kernel,
        out_shape=jax.ShapeDtypeStruct((B, Fp), jnp.float32),
        grid=(1,),
        in_specs=[pl.BlockSpec(a.shape, const2) for a in (xm, pool, w, b)],
        out_specs=pl.BlockSpec((B, Fp), const2),
        compiler_params=pltpu.CompilerParams(dimension_semantics=("arbitrary",)),
    )(xm, pool, w, b)
    return feat_p[:, :F]


def _embs_forward(params, x):
    xm, pool = _pixels_and_pool(x)
    B = pool.shape[0]
    F = params["stu_enc"]["w"].shape[1]
    D = params["stu_proj"]["w"].shape[1]
    Fp = max(LANE, _round_up(F, LANE))
    Dp = max(LANE, _round_up(D, LANE))

    ew = _pad_cols(params["stu_enc"]["w"], Fp)
    eb = _pad_cols(params["stu_enc"]["b"], Fp)
    pw = _pad_cols(_pad_rows(params["stu_proj"]["w"], Fp), Dp)
    pb = _pad_cols(params["stu_proj"]["b"], Dp)
    dw = _pad_cols(_pad_rows(params["stu_pred"]["w"], Dp), Dp)
    db = _pad_cols(params["stu_pred"]["b"], Dp)

    args = (xm, pool, ew, eb, pw, pb, dw, db)
    const2 = lambda i: (0, 0)
    out_shapes = (jax.ShapeDtypeStruct((B, Fp), jnp.float32),
                  jax.ShapeDtypeStruct((B, Dp), jnp.float32),
                  jax.ShapeDtypeStruct((B, Dp), jnp.float32))
    out_specs = (pl.BlockSpec((B, Fp), const2),
                 pl.BlockSpec((B, Dp), const2),
                 pl.BlockSpec((B, Dp), const2))
    feat_p, proj_p, pred_p = pl.pallas_call(
        _embs_kernel,
        out_shape=out_shapes,
        grid=(1,),
        in_specs=[pl.BlockSpec(a.shape, const2) for a in args],
        out_specs=out_specs,
        compiler_params=pltpu.CompilerParams(dimension_semantics=("arbitrary",)),
    )(*args)
    return {"feat": feat_p[:, :F], "proj": proj_p[:, :D], "pred": pred_p[:, :D]}


# ----------------------------------------------------------------------------
# Parameters (deterministic synthetic init)
# TODO(synk): the real module builds the teacher from torch.load(teacher_ckpt)
# and the student from a registry config; here both use synthetic init.
# ----------------------------------------------------------------------------
def _dense_init(key, din, dout):
    kw, kb = jax.random.split(key)
    scale = 1.0 / jnp.sqrt(din).astype(jnp.float32)
    w = jax.random.uniform(kw, (din, dout), jnp.float32, -scale, scale)
    b = jax.random.uniform(kb, (1, dout), jnp.float32, -scale, scale)
    return {"w": w, "b": b}


def init_params(key, c_in, feat_dim, proj_dim):
    ks = jax.random.split(key, 5)
    return {
        "stu_enc": _dense_init(ks[0], c_in, feat_dim),
        "stu_proj": _dense_init(ks[1], feat_dim, proj_dim),
        "stu_pred": _dense_init(ks[2], proj_dim, proj_dim),
        "tea_enc": _dense_init(ks[3], c_in, feat_dim),
        "tea_proj": _dense_init(ks[4], feat_dim, proj_dim),
    }


# ----------------------------------------------------------------------------
# SimsiamDistill forward
# ----------------------------------------------------------------------------
def simsiam_distill_forward(params, x, mode, teacher_mode="train"):
    # TODO(synk): teacher_mode ('train'/'eval') only toggles BatchNorm/Dropout in
    # the real checkpointed teacher; the synthetic teacher here has neither.
    if mode == "train":
        n, two_k = x.shape[0], x.shape[1]
        k = two_k // 2
        C, H, W = x.shape[2], x.shape[3], x.shape[4]
        P = H * W

        def to_views(v):                    # (n, k, C, H, W) -> (k, n*P, C)
            v = jnp.transpose(v, (1, 0, 3, 4, 2))
            return v.reshape(k, n * P, C)

        x_stu = to_views(x[:, :k])
        # teacher path is frozen (torch.no_grad / detach)
        x_tea = jax.lax.stop_gradient(to_views(x[:, k:]))
        tea_params = jax.lax.stop_gradient(
            {"tea_enc": params["tea_enc"], "tea_proj": params["tea_proj"]})
        pool = jnp.repeat(jnp.eye(n, dtype=jnp.float32), P, axis=1) / float(P)
        return _train_loss({**params, **tea_params}, x_stu, x_tea, pool, n, k)
    elif mode == "feat":
        return _feat_forward(params, x)
    elif mode == "embs":
        return _embs_forward(params, x)
    else:
        raise ValueError(mode)


# ----------------------------------------------------------------------------
# Pure-JAX references (sanity check of the fused kernels)
# ----------------------------------------------------------------------------
def _ref_encoder(p, x_nchw):
    B, C, H, W = x_nchw.shape
    xb = jnp.transpose(x_nchw, (0, 2, 3, 1)).reshape(B, H * W, C)
    h = jnp.maximum(
        jnp.einsum("bpc,cd->bpd", xb, p["w"], precision="highest") + p["b"], 0.0)
    return jnp.mean(h, axis=1)


def _ref_dense(p, v, relu):
    h = jnp.dot(v, p["w"], precision="highest") + p["b"]
    return jnp.maximum(h, 0.0) if relu else h


def _reference_embs(params, x):
    feat = _ref_encoder(params["stu_enc"], x)
    proj = _ref_dense(params["stu_proj"], feat, True)
    pred = _ref_dense(params["stu_pred"], proj, False)
    return feat, proj, pred


def _reference_loss(params, x):
    n, two_k = x.shape[0], x.shape[1]
    k = two_k // 2
    outs, gts = [], []
    for i in range(k):
        f = _ref_encoder(params["stu_enc"], x[:, i])
        pr = _ref_dense(params["stu_proj"], f, True)
        outs.append(_ref_dense(params["stu_pred"], pr, False))
        ft = _ref_encoder(params["tea_enc"], x[:, k + i])
        gts.append(_ref_dense(params["tea_proj"], ft, False))
    outp = jnp.stack(outs, axis=1)
    gt = jnp.stack(gts, axis=1)

    def norm(v):
        return v / jnp.maximum(jnp.linalg.norm(v, axis=-1, keepdims=True), 1e-12)

    return -jnp.mean(jnp.sum(norm(outp) * norm(gt), axis=-1))


# ----------------------------------------------------------------------------
if __name__ == "__main__":
    key = jax.random.PRNGKey(0)
    k_data, k_param = jax.random.split(key)

    # data: (n=2, num_views=2k=4, C=4, H=16, W=16)  -- NCHW per view
    data = jax.random.normal(k_data, (2, 4, 4, 16, 16), dtype=jnp.float32)
    params = init_params(k_param, c_in=4, feat_dim=32, proj_dim=32)

    fwd = jax.jit(simsiam_distill_forward, static_argnames=("mode", "teacher_mode"))

    # ---- train mode: single fused pallas_call, parallel grid over views ----
    loss = jax.block_until_ready(fwd(params, data, mode="train"))
    ref = _reference_loss(params, data)
    assert jnp.abs(loss - ref) < 1e-4, (loss, ref)

    # ---- feat / embs modes (fused, lane-padded weights) ---------------------
    single = data[:, 0]                                   # (2, 4, 16, 16)
    feat = jax.block_until_ready(fwd(params, single, mode="feat"))
    embs = fwd(params, single, mode="embs")
    jax.block_until_ready(embs["pred"])

    feat_ref, proj_ref, pred_ref = _reference_embs(params, single)
    assert jnp.max(jnp.abs(feat - feat_ref)) < 1e-4
    assert jnp.max(jnp.abs(embs["feat"] - feat_ref)) < 1e-4
    assert jnp.max(jnp.abs(embs["proj"] - proj_ref)) < 1e-4
    assert jnp.max(jnp.abs(embs["pred"] - pred_ref)) < 1e-4

    print("KERNEL_OK")
</pallas_src>

<mosaic_0001>
module attributes {stable_mosaic.version = 11 : i64} {
  func.func @_train_view_kernel(%arg0: i32, %arg1: memref<1x512x4xf32, #tpu.memory_space<vmem>>, %arg2: memref<1x512x4xf32, #tpu.memory_space<vmem>>, %arg3: memref<2x512xf32, #tpu.memory_space<vmem>>, %arg4: memref<4x32xf32, #tpu.memory_space<vmem>>, %arg5: memref<1x32xf32, #tpu.memory_space<vmem>>, %arg6: memref<32x32xf32, #tpu.memory_space<vmem>>, %arg7: memref<1x32xf32, #tpu.memory_space<vmem>>, %arg8: memref<32x32xf32, #tpu.memory_space<vmem>>, %arg9: memref<1x32xf32, #tpu.memory_space<vmem>>, %arg10: memref<4x32xf32, #tpu.memory_space<vmem>>, %arg11: memref<1x32xf32, #tpu.memory_space<vmem>>, %arg12: memref<32x32xf32, #tpu.memory_space<vmem>>, %arg13: memref<1x32xf32, #tpu.memory_space<vmem>>, %arg14: memref<1x8x128xf32, #tpu.memory_space<vmem>>) attributes {dimension_semantics = [#tpu.dimension_semantics<parallel>], iteration_bounds = array<i64: 2>, scalar_prefetch = 0 : i64, scratch_operands = 0 : i64, tpu.core_type = #tpu.core_type<tc>, window_params = [{transform_indices = @transform_0, window_bounds = array<i64: 1, 512, 4>}, {transform_indices = @transform_1, window_bounds = array<i64: 1, 512, 4>}, {pipeline_mode = #tpu.pipeline_mode<synchronous>, transform_indices = @transform_2, window_bounds = array<i64: 2, 512>}, {pipeline_mode = #tpu.pipeline_mode<synchronous>, transform_indices = @transform_3, window_bounds = array<i64: 4, 32>}, {pipeline_mode = #tpu.pipeline_mode<synchronous>, transform_indices = @transform_4, window_bounds = array<i64: 1, 32>}, {pipeline_mode = #tpu.pipeline_mode<synchronous>, transform_indices = @transform_5, window_bounds = array<i64: 32, 32>}, {pipeline_mode = #tpu.pipeline_mode<synchronous>, transform_indices = @transform_6, window_bounds = array<i64: 1, 32>}, {pipeline_mode = #tpu.pipeline_mode<synchronous>, transform_indices = @transform_7, window_bounds = array<i64: 32, 32>}, {pipeline_mode = #tpu.pipeline_mode<synchronous>, transform_indices = @transform_8, window_bounds = array<i64: 1, 32>}, {pipeline_mode = #tpu.pipeline_mode<synchronous>, transform_indices = @transform_9, window_bounds = array<i64: 4, 32>}, {pipeline_mode = #tpu.pipeline_mode<synchronous>, transform_indices = @transform_10, window_bounds = array<i64: 1, 32>}, {pipeline_mode = #tpu.pipeline_mode<synchronous>, transform_indices = @transform_11, window_bounds = array<i64: 32, 32>}, {pipeline_mode = #tpu.pipeline_mode<synchronous>, transform_indices = @transform_12, window_bounds = array<i64: 1, 32>}, {transform_indices = @transform_13, window_bounds = array<i64: 1, 8, 128>}]} {
    %c0 = arith.constant 0 : index
    %c0_0 = arith.constant 0 : index
    %c0_1 = arith.constant 0 : index
    %0 = vector.load %arg1[%c0, %c0_0, %c0_1] : memref<1x512x4xf32, #tpu.memory_space<vmem>>, vector<1x512x4xf32>
    %1 = vector.shape_cast %0 : vector<1x512x4xf32> to vector<512x4xf32>
    %c0_2 = arith.constant 0 : index
    %c0_3 = arith.constant 0 : index
    %c0_4 = arith.constant 0 : index
    %2 = vector.load %arg2[%c0_2, %c0_3, %c0_4] : memref<1x512x4xf32, #tpu.memory_space<vmem>>, vector<1x512x4xf32>
    %3 = vector.shape_cast %2 : vector<1x512x4xf32> to vector<512x4xf32>
    %c0_5 = arith.constant 0 : index
    %c0_6 = arith.constant 0 : index
    %4 = vector.load %arg3[%c0_5, %c0_6] : memref<2x512xf32, #tpu.memory_space<vmem>>, vector<2x512xf32>
    %c0_7 = arith.constant 0 : index
    %c0_8 = arith.constant 0 : index
    %5 = vector.load %arg4[%c0_7, %c0_8] : memref<4x32xf32, #tpu.memory_space<vmem>>, vector<4x32xf32>
    %cst = arith.constant dense<0.000000e+00> : vector<512x32xf32>
    %6 = tpu.matmul %1, %5, %cst {dimension_numbers = #tpu.dot_dimension_numbers<[1], [0], [0], [1], [0, 0, 1, 1], [], []>} : vector<512x4xf32>, vector<4x32xf32>, vector<512x32xf32> -> vector<512x32xf32>
    %c0_9 = arith.constant 0 : index
    %c0_10 = arith.constant 0 : index
    %7 = vector.load %arg5[%c0_9, %c0_10] : memref<1x32xf32, #tpu.memory_space<vmem>>, vector<1x32xf32>
    %8 = vector.broadcast %7 : vector<1x32xf32> to vector<512x32xf32>
    %9 = arith.addf %6, %8 : vector<512x32xf32>
    %cst_11 = arith.constant 0.000000e+00 : f32
    %10 = vector.broadcast %cst_11 : f32 to vector<512x32xf32>
    %11 = arith.maximumf %9, %10 : vector<512x32xf32>
    %cst_12 = arith.constant dense<0.000000e+00> : vector<2x32xf32>
    %12 = tpu.matmul %4, %11, %cst_12 {dimension_numbers = #tpu.dot_dimension_numbers<[1], [0], [0], [1], [0, 0, 1, 1], [], []>} : vector<2x512xf32>, vector<512x32xf32>, vector<2x32xf32> -> vector<2x32xf32>
    %c0_13 = arith.constant 0 : index
    %c0_14 = arith.constant 0 : index
    %13 = vector.load %arg6[%c0_13, %c0_14] : memref<32x32xf32, #tpu.memory_space<vmem>>, vector<32x32xf32>
    %cst_15 = arith.constant dense<0.000000e+00> : vector<2x32xf32>
    %14 = tpu.matmul %12, %13, %cst_15 {dimension_numbers = #tpu.dot_dimension_numbers<[1], [0], [0], [1], [0, 0, 1, 1], [], []>} : vector<2x32xf32>, vector<32x32xf32>, vector<2x32xf32> -> vector<2x32xf32>
    %c0_16 = arith.constant 0 : index
    %c0_17 = arith.constant 0 : index
    %15 = vector.load %arg7[%c0_16, %c0_17] : memref<1x32xf32, #tpu.memory_space<vmem>>, vector<1x32xf32>
    %16 = vector.broadcast %15 : vector<1x32xf32> to vector<2x32xf32>
    %17 = arith.addf %14, %16 : vector<2x32xf32>
    %cst_18 = arith.constant 0.000000e+00 : f32
    %18 = vector.broadcast %cst_18 : f32 to vector<2x32xf32>
    %19 = arith.maximumf %17, %18 : vector<2x32xf32>
    %c0_19 = arith.constant 0 : index
    %c0_20 = arith.constant 0 : index
    %20 = vector.load %arg8[%c0_19, %c0_20] : memref<32x32xf32, #tpu.memory_space<vmem>>, vector<32x32xf32>
    %cst_21 = arith.constant dense<0.000000e+00> : vector<2x32xf32>
    %21 = tpu.matmul %19, %20, %cst_21 {dimension_numbers = #tpu.dot_dimension_numbers<[1], [0], [0], [1], [0, 0, 1, 1], [], []>} : vector<2x32xf32>, vector<32x32xf32>, vector<2x32xf32> -> vector<2x32xf32>
    %c0_22 = arith.constant 0 : index
    %c0_23 = arith.constant 0 : index
    %22 = vector.load %arg9[%c0_22, %c0_23] : memref<1x32xf32, #tpu.memory_space<vmem>>, vector<1x32xf32>
    %23 = vector.broadcast %22 : vector<1x32xf32> to vector<2x32xf32>
    %24 = arith.addf %21, %23 : vector<2x32xf32>
    %c0_24 = arith.constant 0 : index
    %c0_25 = arith.constant 0 : index
    %25 = vector.load %arg10[%c0_24, %c0_25] : memref<4x32xf32, #tpu.memory_space<vmem>>, vector<4x32xf32>
    %cst_26 = arith.constant dense<0.000000e+00> : vector<512x32xf32>
    %26 = tpu.matmul %3, %25, %cst_26 {dimension_numbers = #tpu.dot_dimension_numbers<[1], [0], [0], [1], [0, 0, 1, 1], [], []>} : vector<512x4xf32>, vector<4x32xf32>, vector<512x32xf32> -> vector<512x32xf32>
    %c0_27 = arith.constant 0 : index
    %c0_28 = arith.constant 0 : index
    %27 = vector.load %arg11[%c0_27, %c0_28] : memref<1x32xf32, #tpu.memory_space<vmem>>, vector<1x32xf32>
    %28 = vector.broadcast %27 : vector<1x32xf32> to vector<512x32xf32>
    %29 = arith.addf %26, %28 : vector<512x32xf32>
    %cst_29 = arith.constant 0.000000e+00 : f32
    %30 = vector.broadcast %cst_29 : f32 to vector<512x32xf32>
    %31 = arith.maximumf %29, %30 : vector<512x32xf32>
    %cst_30 = arith.constant dense<0.000000e+00> : vector<2x32xf32>
    %32 = tpu.matmul %4, %31, %cst_30 {dimension_numbers = #tpu.dot_dimension_numbers<[1], [0], [0], [1], [0, 0, 1, 1], [], []>} : vector<2x512xf32>, vector<512x32xf32>, vector<2x32xf32> -> vector<2x32xf32>
    %c0_31 = arith.constant 0 : index
    %c0_32 = arith.constant 0 : index
    %33 = vector.load %arg12[%c0_31, %c0_32] : memref<32x32xf32, #tpu.memory_space<vmem>>, vector<32x32xf32>
    %cst_33 = arith.constant dense<0.000000e+00> : vector<2x32xf32>
    %34 = tpu.matmul %32, %33, %cst_33 {dimension_numbers = #tpu.dot_dimension_numbers<[1], [0], [0], [1], [0, 0, 1, 1], [], []>} : vector<2x32xf32>, vector<32x32xf32>, vector<2x32xf32> -> vector<2x32xf32>
    %c0_34 = arith.constant 0 : index
    %c0_35 = arith.constant 0 : index
    %35 = vector.load %arg13[%c0_34, %c0_35] : memref<1x32xf32, #tpu.memory_space<vmem>>, vector<1x32xf32>
    %36 = vector.broadcast %35 : vector<1x32xf32> to vector<2x32xf32>
    %37 = arith.addf %34, %36 : vector<2x32xf32>
    %38 = arith.mulf %24, %24 : vector<2x32xf32>
    %cst_36 = arith.constant dense<0.000000e+00> : vector<2xf32>
    %39 = vector.multi_reduction <add>, %38, %cst_36 [1] : vector<2x32xf32> to vector<2xf32>
    %40 = vector.shape_cast %39 : vector<2xf32> to vector<2x1xf32>
    %cst_37 = arith.constant 1.000000e-24 : f32
    %41 = vector.broadcast %cst_37 : f32 to vector<2x1xf32>
    %42 = arith.maximumf %40, %41 : vector<2x1xf32>
    %43 = math.rsqrt %42 : vector<2x1xf32>
    %44 = vector.broadcast %43 : vector<2x1xf32> to vector<2x32xf32>
    %45 = arith.mulf %24, %44 : vector<2x32xf32>
    %46 = arith.mulf %37, %37 : vector<2x32xf32>
    %cst_38 = arith.constant dense<0.000000e+00> : vector<2xf32>
    %47 = vector.multi_reduction <add>, %46, %cst_38 [1] : vector<2x32xf32> to vector<2xf32>
    %48 = vector.shape_cast %47 : vector<2xf32> to vector<2x1xf32>
    %cst_39 = arith.constant 1.000000e-24 : f32
    %49 = vector.broadcast %cst_39 : f32 to vector<2x1xf32>
    %50 = arith.maximumf %48, %49 : vector<2x1xf32>
    %51 = math.rsqrt %50 : vector<2x1xf32>
    %52 = vector.broadcast %51 : vector<2x1xf32> to vector<2x32xf32>
    %53 = arith.mulf %37, %52 : vector<2x32xf32>
    %54 = arith.mulf %45, %53 : vector<2x32xf32>
    %cst_40 = arith.constant dense<0.000000e+00> : vector<2xf32>
    %55 = vector.multi_reduction <add>, %54, %cst_40 [1] : vector<2x32xf32> to vector<2xf32>
    %56 = vector.shape_cast %55 : vector<2xf32> to vector<2x1xf32>
    %cst_41 = arith.constant dense<0.000000e+00> : vector<1xf32>
    %57 = vector.multi_reduction <add>, %56, %cst_41 [0] : vector<2x1xf32> to vector<1xf32>
    %58 = vector.shape_cast %57 : vector<1xf32> to vector<1x1xf32>
    %cst_42 = arith.constant 0.000000e+00 : f32
    %59 = vector.broadcast %cst_42 : f32 to vector<1x1xf32>
    %60 = arith.subf %59, %58 : vector<1x1xf32>
    %cst_43 = arith.constant 2.500000e-01 : f32
    %61 = vector.broadcast %cst_43 : f32 to vector<1x1xf32>
    %62 = arith.mulf %60, %61 : vector<1x1xf32>
    %63 = vector.shape_cast %62 : vector<1x1xf32> to vector<1x1x1xf32>
    %64 = vector.broadcast %63 : vector<1x1x1xf32> to vector<1x8x128xf32>
    %c0_44 = arith.constant 0 : index
    %c0_45 = arith.constant 0 : index
    %c0_46 = arith.constant 0 : index
    %65 = vector.load %arg14[%c0_44, %c0_45, %c0_46] : memref<1x8x128xf32, #tpu.memory_space<vmem>>, vector<1x8x128xf32>
    tpu.vector_store %arg14[%c0_44, %c0_45, %c0_46], %64 {strides = array<i32>} : memref<1x8x128xf32, #tpu.memory_space<vmem>>, vector<1x8x128xf32>,
    return
  }
  func.func @transform_0(%arg0: i32) -> (i32, i32, i32) {
    %c0_i32 = arith.constant 0 : i32
    %c0_i32_0 = arith.constant 0 : i32
    %c0_i32_1 = arith.constant 0 : i32
    return %arg0, %c0_i32, %c0_i32_0 : i32, i32, i32
  }
  func.func @transform_1(%arg0: i32) -> (i32, i32, i32) {
    %c0_i32 = arith.constant 0 : i32
    %c0_i32_0 = arith.constant 0 : i32
    %c0_i32_1 = arith.constant 0 : i32
    return %arg0, %c0_i32, %c0_i32_0 : i32, i32, i32
  }
  func.func @transform_2(%arg0: i32) -> (i32, i32) {
    %c0_i32 = arith.constant 0 : i32
    %c0_i32_0 = arith.constant 0 : i32
    %c0_i32_1 = arith.constant 0 : i32
    return %c0_i32, %c0_i32_0 : i32, i32
  }
  func.func @transform_3(%arg0: i32) -> (i32, i32) {
    %c0_i32 = arith.constant 0 : i32
    %c0_i32_0 = arith.constant 0 : i32
    %c0_i32_1 = arith.constant 0 : i32
    return %c0_i32, %c0_i32_0 : i32, i32
  }
  func.func @transform_4(%arg0: i32) -> (i32, i32) {
    %c0_i32 = arith.constant 0 : i32
    %c0_i32_0 = arith.constant 0 : i32
    %c0_i32_1 = arith.constant 0 : i32
    return %c0_i32, %c0_i32_0 : i32, i32
  }
  func.func @transform_5(%arg0: i32) -> (i32, i32) {
    %c0_i32 = arith.constant 0 : i32
    %c0_i32_0 = arith.constant 0 : i32
    %c0_i32_1 = arith.constant 0 : i32
    return %c0_i32, %c0_i32_0 : i32, i32
  }
  func.func @transform_6(%arg0: i32) -> (i32, i32) {
    %c0_i32 = arith.constant 0 : i32
    %c0_i32_0 = arith.constant 0 : i32
    %c0_i32_1 = arith.constant 0 : i32
    return %c0_i32, %c0_i32_0 : i32, i32
  }
  func.func @transform_7(%arg0: i32) -> (i32, i32) {
    %c0_i32 = arith.constant 0 : i32
    %c0_i32_0 = arith.constant 0 : i32
    %c0_i32_1 = arith.constant 0 : i32
    return %c0_i32, %c0_i32_0 : i32, i32
  }
  func.func @transform_8(%arg0: i32) -> (i32, i32) {
    %c0_i32 = arith.constant 0 : i32
    %c0_i32_0 = arith.constant 0 : i32
    %c0_i32_1 = arith.constant 0 : i32
    return %c0_i32, %c0_i32_0 : i32, i32
  }
  func.func @transform_9(%arg0: i32) -> (i32, i32) {
    %c0_i32 = arith.constant 0 : i32
    %c0_i32_0 = arith.constant 0 : i32
    %c0_i32_1 = arith.constant 0 : i32
    return %c0_i32, %c0_i32_0 : i32, i32
  }
  func.func @transform_10(%arg0: i32) -> (i32, i32) {
    %c0_i32 = arith.constant 0 : i32
    %c0_i32_0 = arith.constant 0 : i32
    %c0_i32_1 = arith.constant 0 : i32
    return %c0_i32, %c0_i32_0 : i32, i32
  }
  func.func @transform_11(%arg0: i32) -> (i32, i32) {
    %c0_i32 = arith.constant 0 : i32
    %c0_i32_0 = arith.constant 0 : i32
    %c0_i32_1 = arith.constant 0 : i32
    return %c0_i32, %c0_i32_0 : i32, i32
  }
  func.func @transform_12(%arg0: i32) -> (i32, i32) {
    %c0_i32 = arith.constant 0 : i32
    %c0_i32_0 = arith.constant 0 : i32
    %c0_i32_1 = arith.constant 0 : i32
    return %c0_i32, %c0_i32_0 : i32, i32
  }
  func.func @transform_13(%arg0: i32) -> (i32, i32, i32) {
    %c0_i32 = arith.constant 0 : i32
    %c0_i32_0 = arith.constant 0 : i32
    %c0_i32_1 = arith.constant 0 : i32
    return %arg0, %c0_i32, %c0_i32_0 : i32, i32, i32
  }
}

</mosaic_0001>

<bundles_post_ra>
// kernel: simsiam_distill_forward.1
= control target key start
LH: loop header
LB: loop body
LE: loop exit
PB: predicated region body
PF: predicated region fallthrough
CT: control target
= control target key end

     0   :  { %s3308_s25 = smov 0   ;;  %s4036_s0 = inlined_call_operand.vmem [shape: f32[2,512,4], index: 0, kind: input, shape index: {}]   ;;  %s4037_s1 = inlined_call_operand.vmem [shape: f32[2,512,4], index: 1, kind: input, shape index: {}]   ;;  %s4038_s2 = inlined_call_operand.vmem [shape: f32[2,512], index: 2, kind: input, shape index: {}]   ;;  %s4039_s3 = inlined_call_operand.vmem [shape: f32[4,32], index: 3, kind: input, shape index: {}]   ;;  %s4040_s4 = inlined_call_operand.vmem [shape: f32[1,32], index: 4, kind: input, shape index: {}]   ;;  %s4041_s5 = inlined_call_operand.vmem [shape: f32[32,32], index: 5, kind: input, shape index: {}]   ;;  %s4042_s6 = inlined_call_operand.vmem [shape: f32[1,32], index: 6, kind: input, shape index: {}]   ;;  %s4043_s7 = inlined_call_operand.vmem [shape: f32[32,32], index: 7, kind: input, shape index: {}]   ;;  %s4044_s8 = inlined_call_operand.vmem [shape: f32[1,32], index: 8, kind: input, shape index: {}]   ;;  %s4045_s9 = inlined_call_operand.vmem [shape: f32[4,32], index: 9, kind: input, shape index: {}]   ;;  %s4046_s10 = inlined_call_operand.vmem [shape: f32[1,32], index: 10, kind: input, shape index: {}]   ;;  %s4047_s11 = inlined_call_operand.vmem [shape: f32[32,32], index: 11, kind: input, shape index: {}]   ;;  %s4048_s12 = inlined_call_operand.vmem [shape: f32[1,32], index: 12, kind: input, shape index: {}]   ;;  %s4049_s13 = inlined_call_operand.vmem [shape: f32[2,8,128], index: 13, kind: output, shape index: {}]  }
   0x1 LB: > { %s2545_s26 = sadd.s32 4294967295, %s3233_s25   ;;  %p2549_p0 = scmp.ge.s32.totalorder %s3233_s25, 1  ;;  %s3233_s25 = sphi %s3308_s25, %s23_s25  }
   0x2   : > { %p397_p1 = scmp.lt.s32.totalorder %s3233_s25, 3 }
   0x4   : > { %p398_p2 = pnand %p2549_p0, %p397_p1 }
   0x5   : > { %p445_p3 = scmp.lt.s32.totalorder (!%p398_p2), %s2545_s26, 1 }
   0x6   : > { %401 = sbr.rel (%p398_p2) target bundleno = 1834 (0x72a), region = 72 }
   0xb   : > { %v588_v0 = vld [vmem:[%s4039_s3] sm:$0xf]  ;;  %vm789_vm0 = vcmask 1043456   ;;  %s4051_s26 = smov (!%p445_p3, %s2545_s26), 1  ;;  %vm596_vm1 = vcmask 31744   ;;  %vm3237_vm2 = vmmov 0  }
   0xc   : > { %2982 = vmatprep.subr.msk.mxu0 %vm789_vm0, %v588_v0  ;;  %s2695_s29 = sshll.u32 %s4051_s26, 9  ;;  %vm1415_vm3 = vcmask 261120   ;;  %vm2451_vm4 = vcmask 254976   ;;  %vm2469_vm5 = vcmask 1041408  }
   0xd   : > { %2983 = vmatpush3.msk.msra.mxu0 %vm789_vm0, %v588_v0  ;;  %s3329_s15 = scalar_lea.vmem %s4036_s0, %s2695_s29  ;;  %s3696_s14 = scalar_lea.vmem %s4037_s1, %s2695_s29 }
   0xe   : > { %v459_v1 = vld [vmem:[%s3329_s15] sm:$0xff]  ;;  %v460_v2 = vld [vmem:[%s3329_s15 + $0x8] sm:$0xff]  ;;  %v461_v3 = vld [vmem:[%s3329_s15 + $0x10] sm:$0xff] }
   0xf   : > { %2984 = vmatprep.mubr.msk.f32.mxu0 %vm596_vm1, %v459_v1  ;;  %v462_v4 = vld [vmem:[%s3329_s15 + $0x18] sm:$0xff]  ;;  %v463_v5 = vld [vmem:[%s3329_s15 + $0x20] sm:$0xff]  ;;  %v464_v6 = vld [vmem:[%s3329_s15 + $0x28] sm:$0xff] }
  0x10   : > { %2985 = vmatmul.mubr.msk.f32.vlgmr.msra.gmra.mxu0 %vm596_vm1, %v460_v2  ;;  %v465_v7 = vld [vmem:[%s3329_s15 + $0x30] sm:$0xff]  ;;  %v466_v8 = vld [vmem:[%s3329_s15 + $0x38] sm:$0xff]  ;;  %v467_v9 = vld [vmem:[%s3329_s15 + $0x40] sm:$0xff] }
  0x11   : > { %2987 = vmatprep.mubr.msk.f32.mxu0 %vm596_vm1, %v461_v3  ;;  %v468_v10 = vld [vmem:[%s3329_s15 + $0x48] sm:$0xff]  ;;  %v469_v11 = vld [vmem:[%s3329_s15 + $0x50] sm:$0xff]  ;;  %v470_v12 = vld [vmem:[%s3329_s15 + $0x58] sm:$0xff] }
  0x12   : > { %v471_v13 = vld [vmem:[%s3329_s15 + $0x60] sm:$0xff]  ;;  %v472_v14 = vld [vmem:[%s3329_s15 + $0x68] sm:$0xff]  ;;  %v473_v15 = vld [vmem:[%s3329_s15 + $0x70] sm:$0xff] }
  0x13   : > { %v474_v16 = vld [vmem:[%s3329_s15 + $0x78] sm:$0xff]  ;;  %v475_v17 = vld [vmem:[%s3329_s15 + $0x80] sm:$0xff]  ;;  %v476_v18 = vld [vmem:[%s3329_s15 + $0x88] sm:$0xff] }
  0x14   : > { %2988 = vmatmul.mubr.msk.f32.gmra.mxu0 %vm596_vm1, %v462_v4  ;;  %v477_v19 = vld [vmem:[%s3329_s15 + $0x90] sm:$0xff]  ;;  %v478_v20 = vld [vmem:[%s3329_s15 + $0x98] sm:$0xff]  ;;  %v479_v21 = vld [vmem:[%s3329_s15 + $0xa0] sm:$0xff] }
  0x15   : > { %2990 = vmatprep.mubr.msk.f32.mxu0 %vm596_vm1, %v463_v5  ;;  %v480_v22 = vld [vmem:[%s3329_s15 + $0xa8] sm:$0xff]  ;;  %v481_v23 = vld [vmem:[%s3329_s15 + $0xb0] sm:$0xff]  ;;  %v482_v24 = vld [vmem:[%s3329_s15 + $0xb8] sm:$0xff] }
  0x16   : > { %v483_v25 = vld [vmem:[%s3329_s15 + $0xc0] sm:$0xff]  ;;  %v484_v26 = vld [vmem:[%s3329_s15 + $0xc8] sm:$0xff]  ;;  %v485_v27 = vld [vmem:[%s3329_s15 + $0xd0] sm:$0xff] }
  0x17   : > { %v486_v28 = vld [vmem:[%s3329_s15 + $0xd8] sm:$0xff]  ;;  %v487_v29 = vld [vmem:[%s3329_s15 + $0xe0] sm:$0xff]  ;;  %v488_v30 = vld [vmem:[%s3329_s15 + $0xe8] sm:$0xff] }
  0x18   : > { %2991 = vmatmul.mubr.msk.f32.gmra.mxu0 %vm596_vm1, %v464_v6  ;;  %v489_v31 = vld [vmem:[%s3329_s15 + $0xf0] sm:$0xff]  ;;  %v490_v32 = vld [vmem:[%s3329_s15 + $0xf8] sm:$0xff]  ;;  %v491_v33 = vld [vmem:[%s3329_s15 + $0x100] sm:$0xff] }
  0x19   : > { %2993 = vmatprep.mubr.msk.f32.mxu0 %vm596_vm1, %v465_v7  ;;  %v492_v34 = vld [vmem:[%s3329_s15 + $0x108] sm:$0xff]  ;;  %v493_v35 = vld [vmem:[%s3329_s15 + $0x110] sm:$0xff]  ;;  %v494_v36 = vld [vmem:[%s3329_s15 + $0x118] sm:$0xff] }
  0x1a   : > { %v495_v37 = vld [vmem:[%s3329_s15 + $0x120] sm:$0xff]  ;;  %v496_v38 = vld [vmem:[%s3329_s15 + $0x128] sm:$0xff]  ;;  %v497_v39 = vld [vmem:[%s3329_s15 + $0x130] sm:$0xff] }
  0x1b   : > { %v498_v40 = vld [vmem:[%s3329_s15 + $0x138] sm:$0xff]  ;;  %v499_v41 = vld [vmem:[%s3329_s15 + $0x140] sm:$0xff]  ;;  %v500_v42 = vld [vmem:[%s3329_s15 + $0x148] sm:$0xff] }
  0x1c   : > { %2994 = vmatmul.mubr.msk.f32.gmra.mxu0 %vm596_vm1, %v466_v8  ;;  %v501_v43 = vld [vmem:[%s3329_s15 + $0x150] sm:$0xff]  ;;  %v502_v44 = vld [vmem:[%s3329_s15 + $0x158] sm:$0xff]  ;;  %v503_v45 = vld [vmem:[%s3329_s15 + $0x160] sm:$0xff] }
  0x1d   : > { %2996 = vmatprep.mubr.msk.f32.mxu0 %vm596_vm1, %v467_v9  ;;  %v504_v46 = vld [vmem:[%s3329_s15 + $0x168] sm:$0xff]  ;;  %v505_v47 = vld [vmem:[%s3329_s15 + $0x170] sm:$0xff]  ;;  %v506_v48 = vld [vmem:[%s3329_s15 + $0x178] sm:$0xff] }
  0x1e   : > { %v507_v49 = vld [vmem:[%s3329_s15 + $0x180] sm:$0xff]  ;;  %v508_v50 = vld [vmem:[%s3329_s15 + $0x188] sm:$0xff]  ;;  %v509_v51 = vld [vmem:[%s3329_s15 + $0x190] sm:$0xff] }
  0x1f   : > { %v510_v52 = vld [vmem:[%s3329_s15 + $0x198] sm:$0xff]  ;;  %v511_v53 = vld [vmem:[%s3329_s15 + $0x1a0] sm:$0xff]  ;;  %v512_v54 = vld [vmem:[%s3329_s15 + $0x1a8] sm:$0xff] }
  0x20   : > { %2997 = vmatmul.mubr.msk.f32.gmra.mxu0 %vm596_vm1, %v468_v10  ;;  %v513_v55 = vld [vmem:[%s3329_s15 + $0x1b0] sm:$0xff]  ;;  %v514_v56 = vld [vmem:[%s3329_s15 + $0x1b8] sm:$0xff]  ;;  %v515_v57 = vld [vmem:[%s3329_s15 + $0x1c0] sm:$0xff] }
  0x21   : > { %2999 = vmatprep.mubr.msk.f32.mxu0 %vm596_vm1, %v469_v11  ;;  %v516_v58 = vld [vmem:[%s3329_s15 + $0x1c8] sm:$0xff]  ;;  %v517_v59 = vld [vmem:[%s3329_s15 + $0x1d0] sm:$0xff]  ;;  %v518_v60 = vld [vmem:[%s3329_s15 + $0x1d8] sm:$0xff] }
  0x22   : > { %v519_v61 = vld [vmem:[%s3329_s15 + $0x1e0] sm:$0xff]  ;;  %v520_v62 = vld [vmem:[%s3329_s15 + $0x1e8] sm:$0xff]  ;;  %v521_v63 = vld [vmem:[%s3329_s15 + $0x1f0] sm:$0xff] }
  0x23   : > { %v522_v0 = vld [vmem:[%s3329_s15 + $0x1f8] sm:$0xff] }
  0x24   : > { %3000 = vmatmul.mubr.msk.f32.gmra.mxu0 %vm596_vm1, %v470_v12  ;;  %v3235_v12 = vmov 1983009808  }
  0x25   : > { %3002 = vmatprep.mubr.msk.f32.mxu0 %vm596_vm1, %v471_v13  ;;  %v1245_v13 = vunpack.c.l.s4 %v3235_v12 }
  0x28   : > { %3003 = vmatmul.mubr.msk.f32.gmra.mxu0 %vm596_vm1, %v472_v14  ;;  %v1247_v14 = vlaneseq }
  0x29   : > { %3005 = vmatprep.mubr.msk.f32.mxu0 %vm596_vm1, %v473_v15 }
  0x2c   : > { %3006 = vmatmul.mubr.msk.f32.gmra.mxu0 %vm596_vm1, %v474_v16  ;;  %v1246_v16 = vunpack.c.0.s8 %v1245_v13 }
  0x2d   : > { %3008 = vmatprep.mubr.msk.f32.mxu0 %vm596_vm1, %v475_v17  ;;  %v1248_v17 = vshrl.u32 %v1247_v14, 7 }
  0x30   : > { %3009 = vmatmul.mubr.msk.f32.gmra.mxu0 %vm596_vm1, %v476_v18 }
  0x31   : > { %3011 = vmatprep.mubr.msk.f32.mxu0 %vm596_vm1, %v477_v19  ;;  %v1249_v19 = vsub.s32 %v1246_v16, %v1248_v17 }
  0x34   : > { %3012 = vmatmul.mubr.msk.f32.gmra.mxu0 %vm596_vm1, %v478_v20  ;;  %v587_v20 = vld [vmem:[%s4038_s2] sm:$0xff] }
  0x35   : > { %3014 = vmatprep.mubr.msk.f32.mxu0 %vm596_vm1, %v479_v21 }
  0x38   : > { %3015 = vmatmul.mubr.msk.f32.gmra.mxu0 %vm596_vm1, %v480_v22  ;;  %v3482_v22 = vrot.slane %v587_v20, %v1249_v19 }
  0x39   : > { %3017 = vmatprep.mubr.msk.f32.mxu0 %vm596_vm1, %v481_v23  ;;  %v1243_v23 = vcombine.high %v587_v20, %v587_v20 }
  0x3c   : > { %3018 = vmatmul.mubr.msk.f32.gmra.mxu0 %vm596_vm1, %v482_v24 }
  0x3d   : > { %3020 = vmatprep.mubr.msk.f32.mxu0 %vm596_vm1, %v483_v25  ;;  %v3486_v25 = vcombine.high %v3482_v22, %v3482_v22 }
  0x40   : > { %3021 = vmatmul.mubr.msk.f32.gmra.mxu0 %vm596_vm1, %v484_v26  ;;  %v3488_v26 = vrot.slane %v1243_v23, %v1249_v19 }
  0x41   : > { %3023 = vmatprep.mubr.msk.f32.mxu0 %vm596_vm1, %v485_v27 }
  0x44   : > { %3024 = vmatmul.mubr.msk.f32.gmra.mxu0 %vm596_vm1, %v486_v28  ;;  %v3493_v28 = vcombine.high %v3488_v26, %v3488_v26 }
  0x45   : > { %3026 = vmatprep.mubr.msk.f32.mxu0 %vm596_vm1, %v487_v29 }
  0x46   : > { %1398 = vmatprep.mubr.f32.mxu1 %v3493_v28 }
  0x48   : > { %3027 = vmatmul.mubr.msk.f32.gmra.mxu0 %vm596_vm1, %v488_v30 }
  0x49   : > { %3029 = vmatprep.mubr.msk.f32.mxu0 %vm596_vm1, %v489_v31 }
  0x4c   : > { %3030 = vmatmul.mubr.msk.f32.gmra.mxu0 %vm596_vm1, %v490_v32 }
  0x4d   : > { %3032 = vmatprep.mubr.msk.f32.mxu0 %vm596_vm1, %v491_v33 }
  0x50   : > { %3033 = vmatmul.mubr.msk.f32.gmra.mxu0 %vm596_vm1, %v492_v34 }
  0x51   : > { %3035 = vmatprep.mubr.msk.f32.mxu0 %vm596_vm1, %v493_v35 }
  0x54   : > { %3036 = vmatmul.mubr.msk.f32.gmra.mxu0 %vm596_vm1, %v494_v36 }
  0x55   : > { %3038 = vmatprep.mubr.msk.f32.mxu0 %vm596_vm1, %v495_v37 }
  0x58   : > { %3039 = vmatmul.mubr.msk.f32.gmra.mxu0 %vm596_vm1, %v496_v38 }
  0x59   : > { %3041 = vmatprep.mubr.msk.f32.mxu0 %vm596_vm1, %v497_v39 }
  0x5c   : > { %3042 = vmatmul.mubr.msk.f32.gmra.mxu0 %vm596_vm1, %v498_v40 }
  0x5d   : > { %3044 = vmatprep.mubr.msk.f32.mxu0 %vm596_vm1, %v499_v41 }
  0x60   : > { %3045 = vmatmul.mubr.msk.f32.gmra.mxu0 %vm596_vm1, %v500_v42 }
  0x61   : > { %3047 = vmatprep.mubr.msk.f32.mxu0 %vm596_vm1, %v501_v43  ;;  %v3511_v43 = vld [vmem:[%s4040_s4] ss:$0 sm:$0xff] }
  0x64   : > { %3048 = vmatmul.mubr.msk.f32.gmra.mxu0 %vm596_vm1, %v502_v44 }
  0x65   : > { %3050 = vmatprep.mubr.msk.f32.mxu0 %vm596_vm1, %v503_v45 }
  0x68   : > { %3051 = vmatmul.mubr.msk.f32.gmra.mxu0 %vm596_vm1, %v504_v46 }
  0x69   : > { %3053 = vmatprep.mubr.msk.f32.mxu0 %vm596_vm1, %v505_v47 }
  0x6c   : > { %3054 = vmatmul.mubr.msk.f32.gmra.mxu0 %vm596_vm1, %v506_v48 }
  0x6d   : > { %3056 = vmatprep.mubr.msk.f32.mxu0 %vm596_vm1, %v507_v49 }
  0x70   : > { %3057 = vmatmul.mubr.msk.f32.gmra.mxu0 %vm596_vm1, %v508_v50 }
  0x71   : > { %3059 = vmatprep.mubr.msk.f32.mxu0 %vm596_vm1, %v509_v51 }
  0x74   : > { %3060 = vmatmul.mubr.msk.f32.gmra.mxu0 %vm596_vm1, %v510_v52 }
  0x75   : > { %3062 = vmatprep.mubr.msk.f32.mxu0 %vm596_vm1, %v511_v53 }
  0x78   : > { %3063 = vmatmul.mubr.msk.f32.gmra.mxu0 %vm596_vm1, %v512_v54 }
  0x79   : > { %3065 = vmatprep.mubr.msk.f32.mxu0 %vm596_vm1, %v513_v55 }
  0x7c   : > { %3066 = vmatmul.mubr.msk.f32.gmra.mxu0 %vm596_vm1, %v514_v56 }
  0x7d   : > { %3068 = vmatprep.mubr.msk.f32.mxu0 %vm596_vm1, %v515_v57 }
  0x80   : > { %3069 = vmatmul.mubr.msk.f32.gmra.mxu0 %vm596_vm1, %v516_v58 }
  0x81   : > { %3071 = vmatprep.mubr.msk.f32.mxu0 %vm596_vm1, %v517_v59 }
  0x84   : > { %3072 = vmatmul.mubr.msk.f32.gmra.mxu0 %vm596_vm1, %v518_v60 }
  0x85   : > { %3074 = vmatprep.mubr.msk.f32.mxu0 %vm596_vm1, %v519_v61 }
  0x88   : > { %3075 = vmatmul.mubr.msk.f32.gmra.mxu0 %vm596_vm1, %v520_v62 }
  0x89   : > { %3077 = vmatprep.mubr.msk.f32.mxu0 %vm596_vm1, %v521_v63 }
  0x8c   : > { %3078 = vmatmul.mubr.msk.f32.gmra.mxu0 %vm596_vm1, %v522_v0 }
  0x8d   : > { %1328 = vmatprep.mubr.f32.mxu0 %v3486_v25 }
  0xd0   : > { %v3459_v1 = vpop.f32.mrf.mxu0 }
  0xd2   : > { %v3461_v2 = vpop.f32.mrf.mxu0 }
  0xd4   : > { %v3463_v3 = vpop.f32.mrf.mxu0 }
  0xd6   : > { %v3465_v4 = vpop.f32.mrf.mxu0 }
  0xd8   : > { %v3467_v5 = vpop.f32.mrf.mxu0 }
  0xda   : > { %v3469_v6 = vpop.f32.mrf.mxu0 }
  0xdc   : > { %v3471_v7 = vpop.f32.mrf.mxu0 }
  0xde   : > { %v3473_v8 = vpop.f32.mrf.mxu0 }
  0xe0   : > { %v3475_v9 = vpop.f32.mrf.mxu0 }
  0xe2   : > { %v3477_v10 = vpop.f32.mrf.mxu0 }
  0xe4   : > { %v3001_v11 = vpop.f32.mrf.mxu0 }
  0xe5   : > { %v915_v62 = vadd.f32 %v3001_v11, %v3511_v43  ;;  %v905_v11 = vadd.f32 %v3475_v9, %v3511_v43  ;;  %v895_v9 = vadd.f32 %v3471_v7, %v3511_v43  ;;  %v885_v7 = vadd.f32 %v3467_v5, %v3511_v43 }
  0xe6   : > { %v909_v15 = vpop.f32.mrf.mxu0 }
  0xe7   : > { %v910_v14 = vadd.f32 %v3511_v43, %v909_v15  ;;  %v1189_v20 = vmax.f32 %v915_v62, 0.0  ;;  %v900_v15 = vadd.f32 %v3511_v43, %v3477_v10  ;;  %v890_v10 = vadd.f32 %v3511_v43, %v3473_v8 }
  0xe8   : > { %v3004_v18 = vpop.f32.mrf.mxu0 }
  0xe9   : > { %v925_v52 = vadd.f32 %v3004_v18, %v3511_v43 }
  0xea   : > { %v919_v21 = vpop.f32.mrf.mxu0 }
  0xeb   : > { %v920_v57 = vadd.f32 %v3511_v43, %v919_v21  ;;  %v1191_v63 = vmax.f32 %v925_v52, 0.0 }
  0xec   : > { %v3007_v24 = vpop.f32.mrf.mxu0 }
  0xed   : > { %v935_v44 = vadd.f32 %v3007_v24, %v3511_v43  ;;  %v1190_v16 = vmax.f32 %v920_v57, 0.0  ;;  %v870_v57 = vadd.f32 %v3511_v43, %v3465_v4  ;;  %v860_v4 = vadd.f32 %v3511_v43, %v3461_v2 }
  0xee   : > { %v929_v27 = vpop.f32.mrf.mxu0 }
  0xef   : > { %v930_v47 = vadd.f32 %v3511_v43, %v929_v27  ;;  %v1193_v53 = vmax.f32 %v935_v44, 0.0  ;;  %v1188_v27 = vmax.f32 %v910_v14, 0.0 }
  0xf0   : > { %v3495_v29 = vpop.f32.mrf.mxu0 }
  0xf1   : > { %v1192_v58 = vmax.f32 %v930_v47, 0.0 }
  0xf2   : > { %v3498_v30 = vpop.f32.mrf.mxu0 }
  0xf4   : > { %v3500_v31 = vpop.f32.mrf.mxu0 }
  0xf6   : > { %v3502_v32 = vpop.f32.mrf.mxu0 }
  0xf8   : > { %v3504_v33 = vpop.f32.mrf.mxu0 }
  0xfa   : > { %v3506_v34 = vpop.f32.mrf.mxu0 }
  0xfc   : > { %v3019_v35 = vpop.f32.mrf.mxu0 }
  0xfe   : > { %v969_v36 = vpop.f32.mrf.mxu0 }
 0x100   : > { %v3022_v37 = vpop.f32.mrf.mxu0 }
 0x101   : > { %v985_v18 = vadd.f32 %v3022_v37, %v3511_v43  ;;  %v975_v37 = vadd.f32 %v3019_v35, %v3511_v43  ;;  %v965_v35 = vadd.f32 %v3504_v33, %v3511_v43  ;;  %v955_v33 = vadd.f32 %v3500_v31, %v3511_v43 }
 0x102   : > { %v979_v38 = vpop.f32.mrf.mxu0  ;;  %v945_v31 = vadd.f32 %v3495_v29, %v3511_v43 }
 0x103   : > { %v980_v23 = vadd.f32 %v3511_v43, %v979_v38  ;;  %v970_v38 = vadd.f32 %v3511_v43, %v969_v36  ;;  %v1201_v47 = vmax.f32 %v975_v37, 0.0  ;;  %v960_v36 = vadd.f32 %v3511_v43, %v3506_v34 }
 0x104   : > { %v3025_v39 = vpop.f32.mrf.mxu0  ;;  %v1199_v5 = vmax.f32 %v965_v35, 0.0  ;;  %v950_v34 = vadd.f32 %v3511_v43, %v3502_v32  ;;  %v940_v32 = vadd.f32 %v3511_v43, %v3498_v30  ;;  %v1195_v29 = vmax.f32 %v945_v31, 0.0 }
 0x105   : > { %v995_v60 = vadd.f32 %v3025_v39, %v3511_v43  ;;  %v1202_v44 = vmax.f32 %v980_v23, 0.0  ;;  %v1200_v8 = vmax.f32 %v970_v38, 0.0 }
 0x106   : > { %v989_v40 = vpop.f32.mrf.mxu0 }
 0x107   : > { %v990_v12 = vadd.f32 %v3511_v43, %v989_v40  ;;  %v1205_v19 = vmax.f32 %v995_v60, 0.0  ;;  %v1203_v40 = vmax.f32 %v985_v18, 0.0 }
 0x108   : > { %v3028_v41 = vpop.f32.mrf.mxu0 }
 0x109   : > { %v1005_v49 = vadd.f32 %v3028_v41, %v3511_v43  ;;  %v1204_v24 = vmax.f32 %v990_v12, 0.0  ;;  %v1187_v41 = vmax.f32 %v905_v11, 0.0  ;;  %v1196_v12 = vmax.f32 %v950_v34, 0.0 }
 0x10a   : > { %v999_v42 = vpop.f32.mrf.mxu0 }
 0x10b   : > { %v1000_v55 = vadd.f32 %v3511_v43, %v999_v42  ;;  %v1207_v61 = vmax.f32 %v1005_v49, 0.0 }
 0x10c   : > { %v3031_v45 = vpop.f32.mrf.mxu0 }
 0x10d   : > { %v1015_v46 = vadd.f32 %v3031_v45, %v3511_v43  ;;  %v1206_v13 = vmax.f32 %v1000_v55, 0.0  ;;  %v1186_v45 = vmax.f32 %v900_v15, 0.0  ;;  %v1183_v55 = vmax.f32 %v885_v7, 0.0 }
 0x10e   : > { %v1009_v48 = vpop.f32.mrf.mxu0 }
 0x10f   : > { %v1209_v50 = vmax.f32 %v1015_v46, 0.0  ;;  %v1010_v51 = vadd.f32 %v3511_v43, %v1009_v48  ;;  %v1185_v48 = vmax.f32 %v895_v9, 0.0 }
 0x110   : > { %v3519_v54 = vpop.f32.mrf.mxu0 }
 0x111   : > { %v1208_v56 = vmax.f32 %v1010_v51, 0.0  ;;  %2762 = vmatprep.subr.mxu0 %v1209_v50  ;;  %v880_v50 = vadd.f32 %v3511_v43, %v3469_v6  ;;  %v1184_v51 = vmax.f32 %v890_v10, 0.0  ;;  %v1198_v6 = vmax.f32 %v960_v36, 0.0 }
 0x112   : > { %v3523_v59 = vpop.f32.mrf.mxu0  ;;  %2763 = vmatpush3.msra.mxu0 %v1193_v53  ;;  %v875_v53 = vadd.f32 %v3463_v3, %v3511_v43  ;;  %v1197_v3 = vmax.f32 %v955_v33, 0.0 }
 0x113   : > { %2764 = vmatprep.subr.mxu0 %v1208_v56 }
 0x114   : > { %v3527_v0 = vpop.f32.mrf.mxu0  ;;  %2765 = vmatpush3.msra.mxu0 %v1192_v58  ;;  %v1182_v58 = vmax.f32 %v880_v50, 0.0  ;;  %v1181_v62 = vmax.f32 %v875_v53, 0.0 }
 0x115   : > { %2766 = vmatprep.subr.mxu0 %v1207_v61  ;;  %v865_v61 = vadd.f32 %v3459_v1, %v3511_v43  ;;  %v1194_v1 = vmax.f32 %v940_v32, 0.0 }
 0x116   : > { %v3531_v17 = vpop.f32.mrf.mxu0  ;;  %2767 = vmatpush3.msra.mxu0 %v1191_v63 }
 0x117   : > { %2768 = vmatprep.subr.mxu0 %v1206_v13  ;;  %v1180_v13 = vmax.f32 %v870_v57, 0.0 }
 0x118   : > { %v3536_v21 = vpop.f32.mrf.mxu0  ;;  %2769 = vmatpush3.msra.mxu0 %v1190_v16  ;;  %v1179_v16 = vmax.f32 %v865_v61, 0.0 }
 0x119   : > { %2770 = vmatprep.subr.mxu0 %v1205_v19  ;;  %v1178_v19 = vmax.f32 %v860_v4, 0.0 }
 0x11a   : > { %v3541_v39 = vpop.f32.mrf.mxu0  ;;  %2771 = vmatpush3.msra.mxu0 %v1189_v20 }
 0x11b   : > { %2772 = vmatprep.subr.mxu0 %v1204_v24 }
 0x11c   : > { %v3546_v42 = vpop.f32.mrf.mxu0  ;;  %2773 = vmatpush3.msra.mxu0 %v1188_v27 }
 0x11d   : > { %2774 = vmatprep.subr.mxu0 %v1203_v40 }
 0x11e   : > { %v3551_v46 = vpop.f32.mrf.mxu0  ;;  %2775 = vmatpush3.msra.mxu0 %v1187_v41 }
 0x11f   : > { %2776 = vmatprep.subr.mxu0 %v1202_v44 }
 0x120   : > { %v3557_v49 = vpop.f32.mrf.mxu0  ;;  %2777 = vmatpush3.msra.mxu0 %v1186_v45 }
 0x121   : > { %2778 = vmatprep.subr.mxu0 %v1201_v47  ;;  %v1065_v4 = vadd.f32 %v3557_v49, %v3511_v43 }
 0x122   : > { %v3563_v52 = vpop.f32.mrf.mxu0  ;;  %2779 = vmatpush3.msra.mxu0 %v1185_v48 }
 0x123   : > { %2780 = vmatprep.subr.mxu0 %v1200_v8 }
 0x124   : > { %v3569_v56 = vpop.f32.mrf.mxu0  ;;  %2781 = vmatpush3.msra.mxu0 %v1184_v51 }
 0x125   : > { %2782 = vmatprep.subr.mxu0 %v1199_v5 }
 0x126   : > { %v3575_v60 = vpop.f32.mrf.mxu0  ;;  %2783 = vmatpush3.msra.mxu0 %v1183_v55 }
 0x127   : > { %2784 = vmatprep.subr.mxu0 %v1198_v6 }
 0x128   : > { %v3052_v63 = vpop.f32.mrf.mxu0  ;;  %2785 = vmatpush3.msra.mxu0 %v1182_v58  ;;  %v1075_v58 = vadd.f32 %v3569_v56, %v3511_v43 }
 0x129   : > { %2786 = vmatprep.subr.mxu0 %v1197_v3  ;;  %v1085_v51 = vadd.f32 %v3052_v63, %v3511_v43 }
 0x12a   : > { %v1079_v14 = vpop.f32.mrf.mxu0  ;;  %2787 = vmatpush3.msra.mxu0 %v1181_v62  ;;  %v1070_v62 = vadd.f32 %v3511_v43, %v3575_v60 }
 0x12b   : > { %2788 = vmatprep.subr.mxu0 %v1196_v12  ;;  %v1080_v55 = vadd.f32 %v3511_v43, %v1079_v14  ;;  %v1223_v31 = vmax.f32 %v1085_v51, 0.0 }
 0x12c   : > { %v3055_v18 = vpop.f32.mrf.mxu0  ;;  %2789 = vmatpush3.msra.mxu0 %v1180_v13  ;;  %v1221_v13 = vmax.f32 %v1075_v58, 0.0 }
 0x12d   : > { %2790 = vmatprep.subr.mxu0 %v1195_v29  ;;  %v1095_v45 = vadd.f32 %v3055_v18, %v3511_v43  ;;  %v1222_v63 = vmax.f32 %v1080_v55, 0.0  ;;  %v1060_v29 = vadd.f32 %v3511_v43, %v3563_v52 }
 0x12e   : > { %v1089_v11 = vpop.f32.mrf.mxu0  ;;  %2791 = vmatpush3.msra.mxu0 %v1179_v16  ;;  %v1220_v16 = vmax.f32 %v1070_v62, 0.0  ;;  %v1491_v62 = vld [vmem:[%s4043_s7 + $0x8] sm:$0xff] }
 0x12f   : > { %2792 = vmatprep.subr.mxu0 %v1194_v1  ;;  %v1090_v7 = vadd.f32 %v3511_v43, %v1089_v11  ;;  %v1225_v33 = vmax.f32 %v1095_v45, 0.0  ;;  %v1055_v1 = vadd.f32 %v3546_v42, %v3511_v43 }
 0x130   : > { %v3585_v30 = vpop.f32.mrf.mxu0  ;;  %2793 = vmatpush3.msra.mxu0 %v1178_v19  ;;  %v1219_v19 = vmax.f32 %v1065_v4, 0.0 }
 0x131   : > { %1329 = vmatmul.mubr.f32.vlgmr.msra.gmra.mxu0 %v3482_v22  ;;  %v1224_v34 = vmax.f32 %v1090_v7, 0.0 }
 0x132   : > { %v3588_v2 = vpop.f32.mrf.mxu0 }
 0x134   : > { %v3590_v20 = vpop.f32.mrf.mxu0 }
 0x136   : > { %v3592_v23 = vpop.f32.mrf.mxu0 }
 0x138   : > { %v3064_v24 = vpop.f32.mrf.mxu0 }
 0x139   : > { %v1125_v52 = vadd.f32 %v3064_v24, %v3511_v43  ;;  %v1115_v24 = vadd.f32 %v3590_v20, %v3511_v43  ;;  %v1105_v20 = vadd.f32 %v3585_v30, %v3511_v43 }
 0x13a   : > { %v3594_v15 = vpop.f32.mrf.mxu0 }
 0x13b   : > { %v1120_v42 = vadd.f32 %v3511_v43, %v3594_v15  ;;  %v1110_v15 = vadd.f32 %v3511_v43, %v3592_v23  ;;  %v1229_v7 = vmax.f32 %v1115_v24, 0.0  ;;  %v1100_v23 = vadd.f32 %v3511_v43, %v3588_v2  ;;  %v1405_v2 = vld [vmem:[%s4041_s5 + $0x8] sm:$0xff]  ;;  %v542_v24 = vld [vmem:[%s3696_s14 + $0x98] sm:$0xff] }
 0x13c   : > { %v3067_v27 = vpop.f32.mrf.mxu0 }
 0x13d   : > { %v1135_v60 = vadd.f32 %v3067_v27, %v3511_v43  ;;  %v1045_v27 = vadd.f32 %v3536_v21, %v3511_v43  ;;  %v1035_v21 = vadd.f32 %v3527_v0, %v3511_v43  ;;  %v1025_v0 = vadd.f32 %v3519_v54, %v3511_v43 }
 0x13e   : > { %v1129_v37 = vpop.f32.mrf.mxu0  ;;  %v1226_v51 = vmax.f32 %v1100_v23, 0.0  ;;  %v3236_v54 = vmov 0.0   ;;  %v554_v23 = vld [vmem:[%s3696_s14 + $0xf8] sm:$0xff] }
 0x13f   : > { %v1130_v49 = vadd.f32 %v3511_v43, %v1129_v37  ;;  %v1215_v45 = vmax.f32 %v1045_v27, 0.0  ;;  %v1211_v30 = vmax.f32 %v1025_v0, 0.0  ;;  %3080 = vmatprep.subr.mxu0 %v3236_v54  ;;  %3088 = vmatprep.mubr.msk.f32.mxu0 %vm3237_vm2, %v3236_v54  ;;  %v536_v27 = vld [vmem:[%s3696_s14 + $0x68] sm:$0xff] }
 0x140   : > { %v3070_v40 = vpop.f32.mrf.mxu0  ;;  %v552_v0 = vld [vmem:[%s3696_s14 + $0xe8] sm:$0xff] }
 0x141   : > { %v1145_v32 = vadd.f32 %v3070_v40, %v3511_v43  ;;  %v1050_v40 = vadd.f32 %v3511_v43, %v3551_v46  ;;  %v1232_v37 = vmax.f32 %v1130_v49, 0.0  ;;  %v530_v49 = vld [vmem:[%s3696_s14 + $0x38] sm:$0xff] }
 0x142   : > { %v1139_v9 = vpop.f32.mrf.mxu0 }
 0x143   : > { %v1140_v56 = vadd.f32 %v3511_v43, %v1139_v9  ;;  %v1235_v18 = vmax.f32 %v1145_v32, 0.0  ;;  %v1218_v9 = vmax.f32 %v1060_v29, 0.0  ;;  %v1216_v46 = vmax.f32 %v1050_v40, 0.0  ;;  %v2621_v32 = vld [vmem:[%s4042_s6] ss:$0 sm:$0xff]  ;;  %v524_v29 = vld [vmem:[%s3696_s14 + $0x8] sm:$0xff] }
 0x144   : > { %v3073_v41 = vpop.f32.mrf.mxu0  ;;  %v532_v40 = vld [vmem:[%s3696_s14 + $0x48] sm:$0xff] }
 0x145   : > { %v1155_v6 = vadd.f32 %v3073_v41, %v3511_v43  ;;  %v1234_v11 = vmax.f32 %v1140_v56, 0.0  ;;  %v1233_v41 = vmax.f32 %v1135_v60, 0.0  ;;  %v526_v60 = vld [vmem:[%s3696_s14 + $0x18] sm:$0xff] }
 0x146   : > { %v1149_v38 = vpop.f32.mrf.mxu0 }
 0x147   : > { %v1150_v3 = vadd.f32 %v3511_v43, %v1149_v38  ;;  %v1237_v12 = vmax.f32 %v1155_v6, 0.0  ;;  %v1217_v38 = vmax.f32 %v1055_v1, 0.0  ;;  %v528_v1 = vld [vmem:[%s3696_s14 + $0x28] sm:$0xff] }
 0x148   : > { %v3076_v44 = vpop.f32.mrf.mxu0 }
 0x149   : > { %v1165_v36 = vadd.f32 %v3076_v44, %v3511_v43  ;;  %v1236_v14 = vmax.f32 %v1150_v3, 0.0  ;;  %v1040_v44 = vadd.f32 %v3511_v43, %v3541_v39  ;;  %v1030_v39 = vadd.f32 %v3511_v43, %v3531_v17 }
 0x14a   : > { %v1159_v10 = vpop.f32.mrf.mxu0  ;;  %v1020_v17 = vadd.f32 %v3511_v43, %v3523_v59  ;;  %v1406_v59 = vld [vmem:[%s4041_s5 + $0x10] sm:$0xff] }
 0x14b   : > { %v1160_v5 = vadd.f32 %v3511_v43, %v1159_v10  ;;  %v1239_v57 = vmax.f32 %v1165_v36, 0.0  ;;  %v1231_v10 = vmax.f32 %v1125_v52, 0.0  ;;  %v1228_v36 = vmax.f32 %v1110_v15, 0.0  ;;  %v534_v52 = vld [vmem:[%s3696_s14 + $0x58] sm:$0xff] }
 0x14c   : > { %v3079_v35 = vpop.f32.mrf.mxu0  ;;  %v546_v15 = vld [vmem:[%s3696_s14 + $0xb8] sm:$0xff] }
 0x14d   : > { %v1175_v47 = vadd.f32 %v3079_v35, %v3511_v43  ;;  %v1238_v61 = vmax.f32 %v1160_v5, 0.0  ;;  %v1230_v35 = vmax.f32 %v1120_v42, 0.0  ;;  %v1404_v5 = vld [vmem:[%s4041_s5] sm:$0xff]  ;;  %v538_v42 = vld [vmem:[%s3696_s14 + $0x78] sm:$0xff] }
 0x14e   : > { %v1169_v48 = vpop.f32.mrf.mxu0 }
 0x14f   : > { %v1170_v8 = vadd.f32 %v3511_v43, %v1169_v48  ;;  %v1241_v50 = vmax.f32 %v1175_v47, 0.0  ;;  %v1214_v47 = vmax.f32 %v1040_v44, 0.0  ;;  %v1213_v48 = vmax.f32 %v1035_v21, 0.0  ;;  %v1407_v43 = vld [vmem:[%s4041_s5 + $0x18] sm:$0xff]  ;;  %v540_v44 = vld [vmem:[%s3696_s14 + $0x88] sm:$0xff] }
 0x150   : > { %3081 = vmatpush3.msra.mxu0 %v1407_v43  ;;  %v544_v21 = vld [vmem:[%s3696_s14 + $0xa8] sm:$0xff]  ;;  %v562_v43 = vld [vmem:[%s3696_s14 + $0x138] sm:$0xff] }
 0x151   : > { %v1240_v53 = vmax.f32 %v1170_v8, 0.0  ;;  %2797 = vmatprep.subr.mxu1 %v1241_v50  ;;  %v1212_v8 = vmax.f32 %v1030_v39, 0.0  ;;  %v1227_v50 = vmax.f32 %v1105_v20, 0.0  ;;  %3082 = vmatprep.subr.mxu0 %v3236_v54  ;;  %v548_v39 = vld [vmem:[%s3696_s14 + $0xc8] sm:$0xff]  ;;  %v550_v20 = vld [vmem:[%s3696_s14 + $0xd8] sm:$0xff] }
 0x152   : > { %2798 = vmatpush3.msra.mxu1 %v1225_v33  ;;  %v1210_v33 = vmax.f32 %v1020_v17, 0.0  ;;  %3083 = vmatpush3.msra.mxu0 %v1406_v59  ;;  %v556_v17 = vld [vmem:[%s3696_s14 + $0x108] sm:$0xff]  ;;  %v563_v59 = vld [vmem:[%s3696_s14 + $0x140] sm:$0xff] }
 0x153   : > { %2799 = vmatprep.subr.mxu1 %v1240_v53  ;;  %3084 = vmatprep.subr.mxu0 %v3236_v54  ;;  %v1493_v53 = vld [vmem:[%s4043_s7 + $0x18] sm:$0xff] }
 0x154   : > { %2800 = vmatpush3.msra.mxu1 %v1224_v34  ;;  %3085 = vmatpush3.msra.mxu0 %v1405_v2  ;;  %v564_v2 = vld [vmem:[%s3696_s14 + $0x148] sm:$0xff] }
 0x155   : > { %2801 = vmatprep.subr.mxu1 %v1239_v57  ;;  %3086 = vmatprep.subr.mxu0 %v3236_v54 }
 0x156   : > { %2802 = vmatpush3.msra.mxu1 %v1223_v31  ;;  %3087 = vmatpush3.msra.mxu0 %v1404_v5  ;;  %v565_v5 = vld [vmem:[%s3696_s14 + $0x150] sm:$0xff] }
 0x157   : > { %2803 = vmatprep.subr.mxu1 %v1238_v61  ;;  %v1492_v61 = vld [vmem:[%s4043_s7 + $0x10] sm:$0xff] }
 0x158   : > { %2804 = vmatpush3.msra.mxu1 %v1222_v63  ;;  %v1490_v63 = vld [vmem:[%s4043_s7] sm:$0xff] }
 0x159   : > { %2805 = vmatprep.subr.mxu1 %v1237_v12 }
 0x15a   : > { %2806 = vmatpush3.msra.mxu1 %v1221_v13 }
 0x15b   : > { %2807 = vmatprep.subr.mxu1 %v1236_v14  ;;  %v523_v14 = vld [vmem:[%s3696_s14] sm:$0xff] }
 0x15c   : > { %2808 = vmatpush3.msra.mxu1 %v1220_v16  ;;  %v525_v16 = vld [vmem:[%s3696_s14 + $0x10] sm:$0xff] }
 0x15d   : > { %2809 = vmatprep.subr.mxu1 %v1235_v18  ;;  %v527_v18 = vld [vmem:[%s3696_s14 + $0x20] sm:$0xff] }
 0x15e   : > { %2810 = vmatpush3.msra.mxu1 %v1219_v19  ;;  %v529_v19 = vld [vmem:[%s3696_s14 + $0x30] sm:$0xff] }
 0x15f   : > { %2811 = vmatprep.subr.mxu1 %v1234_v11  ;;  %v531_v11 = vld [vmem:[%s3696_s14 + $0x40] sm:$0xff] }
 0x160   : > { %2812 = vmatpush3.msra.mxu1 %v1218_v9  ;;  %v533_v9 = vld [vmem:[%s3696_s14 + $0x50] sm:$0xff] }
 0x161   : > { %2813 = vmatprep.subr.mxu1 %v1233_v41  ;;  %v535_v41 = vld [vmem:[%s3696_s14 + $0x60] sm:$0xff] }
 0x162   : > { %2814 = vmatpush3.msra.mxu1 %v1217_v38  ;;  %v537_v38 = vld [vmem:[%s3696_s14 + $0x70] sm:$0xff] }
 0x163   : > { %2815 = vmatprep.subr.mxu1 %v1232_v37  ;;  %v539_v37 = vld [vmem:[%s3696_s14 + $0x80] sm:$0xff] }
 0x164   : > { %2816 = vmatpush3.msra.mxu1 %v1216_v46  ;;  %v541_v46 = vld [vmem:[%s3696_s14 + $0x90] sm:$0xff] }
 0x165   : > { %2817 = vmatprep.subr.mxu1 %v1231_v10  ;;  %v543_v10 = vld [vmem:[%s3696_s14 + $0xa0] sm:$0xff] }
 0x166   : > { %2818 = vmatpush3.msra.mxu1 %v1215_v45  ;;  %v545_v45 = vld [vmem:[%s3696_s14 + $0xb0] sm:$0xff] }
 0x167   : > { %2819 = vmatprep.subr.mxu1 %v1230_v35  ;;  %v547_v35 = vld [vmem:[%s3696_s14 + $0xc0] sm:$0xff] }
 0x168   : > { %2820 = vmatpush3.msra.mxu1 %v1214_v47  ;;  %v549_v47 = vld [vmem:[%s3696_s14 + $0xd0] sm:$0xff] }
 0x169   : > { %2821 = vmatprep.subr.mxu1 %v1229_v7  ;;  %v551_v7 = vld [vmem:[%s3696_s14 + $0xe0] sm:$0xff] }
 0x16a   : > { %2822 = vmatpush3.msra.mxu1 %v1213_v48  ;;  %v553_v48 = vld [vmem:[%s3696_s14 + $0xf0] sm:$0xff] }
 0x16b   : > { %2823 = vmatprep.subr.mxu1 %v1228_v36  ;;  %v555_v36 = vld [vmem:[%s3696_s14 + $0x100] sm:$0xff] }
 0x16c   : > { %2824 = vmatpush3.msra.mxu1 %v1212_v8  ;;  %v557_v8 = vld [vmem:[%s3696_s14 + $0x110] sm:$0xff] }
 0x16d   : > { %2825 = vmatprep.subr.mxu1 %v1227_v50  ;;  %v558_v50 = vld [vmem:[%s3696_s14 + $0x118] sm:$0xff] }
 0x16e   : > { %2826 = vmatpush3.msra.mxu1 %v1211_v30  ;;  %v559_v30 = vld [vmem:[%s3696_s14 + $0x120] sm:$0xff] }
 0x16f   : > { %2827 = vmatprep.subr.mxu1 %v1226_v51  ;;  %v560_v51 = vld [vmem:[%s3696_s14 + $0x128] sm:$0xff] }
 0x170   : > { %2828 = vmatpush3.msra.mxu1 %v1210_v33  ;;  %v561_v33 = vld [vmem:[%s3696_s14 + $0x130] sm:$0xff] }
 0x171   : > { %1399 = vmatmul.mubr.f32.vlgmr.msra.gmra.mxu1 %v3488_v26  ;;  %3091 = vmatprep.subr.mxu1 %v3236_v54 }
 0x172   : > { %3099 = vmatprep.mubr.msk.f32.mxu1 %vm3237_vm2, %v3236_v54  ;;  %3092 = vmatpush3.msra.mxu1 %v1493_v53  ;;  %v566_v53 = vld [vmem:[%s3696_s14 + $0x158] sm:$0xff] }
 0x173   : > { %3093 = vmatprep.subr.mxu1 %v3236_v54 }
 0x174   : > { %3094 = vmatpush3.msra.mxu1 %v1492_v61  ;;  %v574_v61 = vld [vmem:[%s3696_s14 + $0x198] sm:$0xff] }
 0x175   : > { %3095 = vmatprep.subr.mxu1 %v3236_v54 }
 0x176   : > { %3096 = vmatpush3.msra.mxu1 %v1491_v62  ;;  %v575_v62 = vld [vmem:[%s3696_s14 + $0x1a0] sm:$0xff] }
 0x177   : > { %3097 = vmatprep.subr.mxu1 %v3236_v54 }
 0x178   : > { %3098 = vmatpush3.msra.mxu1 %v1490_v63  ;;  %v576_v63 = vld [vmem:[%s3696_s14 + $0x1a8] sm:$0xff] }
 0x1f1   : > { %v2794_v55 = vpop.f32.mrf.mxu0 }
 0x1f3   : > { %v2795_v34 = vpop.f32.mrf.mxu0 }
 0x1f4   : > { %v2796_v58 = vadd.f32 %v2795_v34, %v2794_v55  ;;  %v567_v55 = vld [vmem:[%s3696_s14 + $0x160] sm:$0xff]  ;;  %v568_v34 = vld [vmem:[%s3696_s14 + $0x168] sm:$0xff] }
 0x231   : > { %v2829_v6 = vpop.f32.mrf.mxu1 }
 0x233   : > { %v2830_v57 = vpop.f32.mrf.mxu1 }
 0x234   : > { %v2831_v31 = vadd.f32 %v2830_v57, %v2829_v6  ;;  %v569_v6 = vld [vmem:[%s3696_s14 + $0x170] sm:$0xff]  ;;  %v570_v57 = vld [vmem:[%s3696_s14 + $0x178] sm:$0xff] }
 0x236   : > { %v1401_v3 = vadd.f32 %v2831_v31, %v2796_v58  ;;  %v571_v58 = vld [vmem:[%s3696_s14 + $0x180] sm:$0xff]  ;;  %v572_v31 = vld [vmem:[%s3696_s14 + $0x188] sm:$0xff] }
 0x238   : > { %3089 = vmatmul.mubr.msk.f32.vlgmr.msra.gmra.mxu0 %vm1415_vm3, %v1401_v3  ;;  %v573_v3 = vld [vmem:[%s3696_s14 + $0x190] sm:$0xff] }
 0x239   : > { %2360 = vmatprep.mubr.f32.mxu0 %v3493_v28  ;;  %v1574_v28 = vld [vmem:[%s4045_s9] sm:$0xf] }
 0x23a   : > { %3102 = vmatprep.subr.msk.mxu1 %vm789_vm0, %v1574_v28 }
 0x2f8   : > { %v1485_v12 = vpop.f32.mrf.mxu0 }
 0x2f9   : > { %v1486_v4 = vadd.f32 %v2621_v32, %v1485_v12  ;;  %v578_v32 = vld [vmem:[%s3696_s14 + $0x1b8] sm:$0xff]  ;;  %v579_v12 = vld [vmem:[%s3696_s14 + $0x1c0] sm:$0xff] }
 0x2fa   : > { %v3090_v13 = vpop.f32.mrf.mxu0 }
 0x2fb   : > { %v1489_v56 = vmax.f32 %v1486_v4, 0.0  ;;  %v580_v4 = vld [vmem:[%s3696_s14 + $0x1c8] sm:$0xff]  ;;  %v581_v13 = vld [vmem:[%s3696_s14 + $0x1d0] sm:$0xff] }
 0x2fd   : > { %3100 = vmatmul.mubr.msk.f32.vlgmr.msra.gmra.mxu1 %vm1415_vm3, %v1489_v56  ;;  %v582_v56 = vld [vmem:[%s3696_s14 + $0x1d8] sm:$0xff] }
 0x2fe   : > { %3103 = vmatpush3.msk.msra.mxu1 %vm789_vm0, %v1574_v28  ;;  %3104 = vmatprep.mubr.msk.f32.mxu1 %vm596_vm1, %v523_v14  ;;  %v577_v28 = vld [vmem:[%s3696_s14 + $0x1b0] sm:$0xff]  ;;  %v583_v14 = vld [vmem:[%s3696_s14 + $0x1e0] sm:$0xff] }
 0x301   : > { %3105 = vmatmul.mubr.msk.f32.vlgmr.msra.gmra.mxu1 %vm596_vm1, %v524_v29  ;;  %v584_v29 = vld [vmem:[%s3696_s14 + $0x1e8] sm:$0xff] }
 0x302   : > { %3107 = vmatprep.mubr.msk.f32.mxu1 %vm596_vm1, %v525_v16  ;;  %v585_v16 = vld [vmem:[%s3696_s14 + $0x1f0] sm:$0xff] }
 0x305   : > { %3108 = vmatmul.mubr.msk.f32.gmra.mxu1 %vm596_vm1, %v526_v60  ;;  %v586_v60 = vld [vmem:[%s3696_s14 + $0x1f8] sm:$0xff]  ;;  %s2554_s14 = sshll.u32 %s4051_s26, 3 }
 0x306   : > { %3110 = vmatprep.mubr.msk.f32.mxu1 %vm596_vm1, %v527_v18  ;;  %v2623_v18 = vld [vmem:[%s4044_s8] ss:$0 sm:$0xff]  ;;  %s458_s16 = scalar_lea.vmem %s4049_s13, %s2554_s14 }
 0x309   : > { %3111 = vmatmul.mubr.msk.f32.gmra.mxu1 %vm596_vm1, %v528_v1 }
 0x30a   : > { %3113 = vmatprep.mubr.msk.f32.mxu1 %vm596_vm1, %v529_v19 }
 0x30d   : > { %3114 = vmatmul.mubr.msk.f32.gmra.mxu1 %vm596_vm1, %v530_v49 }
 0x30e   : > { %3116 = vmatprep.mubr.msk.f32.mxu1 %vm596_vm1, %v531_v11 }
 0x311   : > { %3117 = vmatmul.mubr.msk.f32.gmra.mxu1 %vm596_vm1, %v532_v40 }
 0x312   : > { %3119 = vmatprep.mubr.msk.f32.mxu1 %vm596_vm1, %v533_v9 }
 0x315   : > { %3120 = vmatmul.mubr.msk.f32.gmra.mxu1 %vm596_vm1, %v534_v52 }
 0x316   : > { %3122 = vmatprep.mubr.msk.f32.mxu1 %vm596_vm1, %v535_v41 }
 0x319   : > { %3123 = vmatmul.mubr.msk.f32.gmra.mxu1 %vm596_vm1, %v536_v27 }
 0x31a   : > { %3125 = vmatprep.mubr.msk.f32.mxu1 %vm596_vm1, %v537_v38 }
 0x31d   : > { %3126 = vmatmul.mubr.msk.f32.gmra.mxu1 %vm596_vm1, %v538_v42 }
 0x31e   : > { %3128 = vmatprep.mubr.msk.f32.mxu1 %vm596_vm1, %v539_v37 }
 0x321   : > { %3129 = vmatmul.mubr.msk.f32.gmra.mxu1 %vm596_vm1, %v540_v44 }
 0x322   : > { %3131 = vmatprep.mubr.msk.f32.mxu1 %vm596_vm1, %v541_v46 }
 0x325   : > { %3132 = vmatmul.mubr.msk.f32.gmra.mxu1 %vm596_vm1, %v542_v24 }
 0x326   : > { %3134 = vmatprep.mubr.msk.f32.mxu1 %vm596_vm1, %v543_v10 }
 0x329   : > { %3135 = vmatmul.mubr.msk.f32.gmra.mxu1 %vm596_vm1, %v544_v21 }
 0x32a   : > { %3137 = vmatprep.mubr.msk.f32.mxu1 %vm596_vm1, %v545_v45 }
 0x32d   : > { %3138 = vmatmul.mubr.msk.f32.gmra.mxu1 %vm596_vm1, %v546_v15 }
 0x32e   : > { %3140 = vmatprep.mubr.msk.f32.mxu1 %vm596_vm1, %v547_v35 }
 0x331   : > { %3141 = vmatmul.mubr.msk.f32.gmra.mxu1 %vm596_vm1, %v548_v39 }
 0x332   : > { %3143 = vmatprep.mubr.msk.f32.mxu1 %vm596_vm1, %v549_v47 }
 0x335   : > { %3144 = vmatmul.mubr.msk.f32.gmra.mxu1 %vm596_vm1, %v550_v20 }
 0x336   : > { %3146 = vmatprep.mubr.msk.f32.mxu1 %vm596_vm1, %v551_v7 }
 0x339   : > { %3147 = vmatmul.mubr.msk.f32.gmra.mxu1 %vm596_vm1, %v552_v0 }
 0x33a   : > { %3149 = vmatprep.mubr.msk.f32.mxu1 %vm596_vm1, %v553_v48 }
 0x33d   : > { %3150 = vmatmul.mubr.msk.f32.gmra.mxu1 %vm596_vm1, %v554_v23 }
 0x33e   : > { %3152 = vmatprep.mubr.msk.f32.mxu1 %vm596_vm1, %v555_v36 }
 0x341   : > { %3153 = vmatmul.mubr.msk.f32.gmra.mxu1 %vm596_vm1, %v556_v17 }
 0x342   : > { %3155 = vmatprep.mubr.msk.f32.mxu1 %vm596_vm1, %v557_v8 }
 0x345   : > { %3156 = vmatmul.mubr.msk.f32.gmra.mxu1 %vm596_vm1, %v558_v50 }
 0x346   : > { %3158 = vmatprep.mubr.msk.f32.mxu1 %vm596_vm1, %v559_v30 }
 0x349   : > { %3159 = vmatmul.mubr.msk.f32.gmra.mxu1 %vm596_vm1, %v560_v51 }
 0x34a   : > { %3161 = vmatprep.mubr.msk.f32.mxu1 %vm596_vm1, %v561_v33 }
 0x34d   : > { %3162 = vmatmul.mubr.msk.f32.gmra.mxu1 %vm596_vm1, %v562_v43  ;;  %v3870_v43 = vld [vmem:[%s4046_s10] ss:$0 sm:$0xff] }
 0x34e   : > { %3164 = vmatprep.mubr.msk.f32.mxu1 %vm596_vm1, %v563_v59 }
 0x351   : > { %3165 = vmatmul.mubr.msk.f32.gmra.mxu1 %vm596_vm1, %v564_v2 }
 0x352   : > { %3167 = vmatprep.mubr.msk.f32.mxu1 %vm596_vm1, %v565_v5 }
 0x355   : > { %3168 = vmatmul.mubr.msk.f32.gmra.mxu1 %vm596_vm1, %v566_v53 }
 0x356   : > { %3170 = vmatprep.mubr.msk.f32.mxu1 %vm596_vm1, %v567_v55 }
 0x359   : > { %3171 = vmatmul.mubr.msk.f32.gmra.mxu1 %vm596_vm1, %v568_v34 }
 0x35a   : > { %3173 = vmatprep.mubr.msk.f32.mxu1 %vm596_vm1, %v569_v6 }
 0x35d   : > { %3174 = vmatmul.mubr.msk.f32.gmra.mxu1 %vm596_vm1, %v570_v57 }
 0x35e   : > { %3176 = vmatprep.mubr.msk.f32.mxu1 %vm596_vm1, %v571_v58 }
 0x361   : > { %3177 = vmatmul.mubr.msk.f32.gmra.mxu1 %vm596_vm1, %v572_v31 }
 0x362   : > { %3179 = vmatprep.mubr.msk.f32.mxu1 %vm596_vm1, %v573_v3 }
 0x365   : > { %3180 = vmatmul.mubr.msk.f32.gmra.mxu1 %vm596_vm1, %v574_v61 }
 0x366   : > { %3182 = vmatprep.mubr.msk.f32.mxu1 %vm596_vm1, %v575_v62 }
 0x369   : > { %3183 = vmatmul.mubr.msk.f32.gmra.mxu1 %vm596_vm1, %v576_v63 }
 0x36a   : > { %3185 = vmatprep.mubr.msk.f32.mxu1 %vm596_vm1, %v577_v28 }
 0x36d   : > { %3186 = vmatmul.mubr.msk.f32.gmra.mxu1 %vm596_vm1, %v578_v32 }
 0x36e   : > { %3188 = vmatprep.mubr.msk.f32.mxu1 %vm596_vm1, %v579_v12 }
 0x371   : > { %3189 = vmatmul.mubr.msk.f32.gmra.mxu1 %vm596_vm1, %v580_v4 }
 0x372   : > { %3191 = vmatprep.mubr.msk.f32.mxu1 %vm596_vm1, %v581_v13 }
 0x375   : > { %3192 = vmatmul.mubr.msk.f32.gmra.mxu1 %vm596_vm1, %v582_v56 }
 0x376   : > { %3194 = vmatprep.mubr.msk.f32.mxu1 %vm596_vm1, %v583_v14 }
 0x379   : > { %3195 = vmatmul.mubr.msk.f32.gmra.mxu1 %vm596_vm1, %v584_v29 }
 0x37a   : > { %3197 = vmatprep.mubr.msk.f32.mxu1 %vm596_vm1, %v585_v16 }
 0x37d   : > { %3198 = vmatmul.mubr.msk.f32.gmra.mxu1 %vm596_vm1, %v586_v60 }
 0x37e   : > { %2290 = vmatprep.mubr.f32.mxu1 %v3486_v25 }
 0x3bd   : > { %v1570_v1 = vpop.f32.mrf.mxu1 }
 0x3be   : > { %v3832_v19 = vadd.f32 %v2623_v18, %v1570_v1 }
 0x3bf   : > { %v3101_v49 = vpop.f32.mrf.mxu1 }
 0x3c0   : > { %v2450_v11 = vmul.f32 %v3832_v19, %v3832_v19 }
 0x3c1   : > { %v3836_v40 = vpop.f32.mrf.mxu1 }
 0x3c2   : > { %v2452_v9 = vsel %vm2451_vm4, %v2450_v11, 0.0 }
 0x3c3   : > { %2453 = vadd.xlane.f32.xlu0 %v2452_v9  ;;  %v3839_v52 = vpop.f32.mrf.mxu1 }
 0x3c5   : > { %v3841_v25 = vpop.f32.mrf.mxu1 }
 0x3c7   : > { %v3843_v41 = vpop.f32.mrf.mxu1 }
 0x3c9   : > { %v3845_v27 = vpop.f32.mrf.mxu1 }
 0x3cb   : > { %v3847_v38 = vpop.f32.mrf.mxu1 }
 0x3cd   : > { %v3849_v42 = vpop.f32.mrf.mxu1 }
 0x3cf   : > { %v3851_v37 = vpop.f32.mrf.mxu1 }
 0x3d1   : > { %v3118_v44 = vpop.f32.mrf.mxu1 }
 0x3d2   : > { %v1889_v9 = vadd.f32 %v3118_v44, %v3870_v43  ;;  %v1879_v44 = vadd.f32 %v3849_v42, %v3870_v43  ;;  %v1869_v42 = vadd.f32 %v3845_v27, %v3870_v43 }
 0x3d3   : > { %v3853_v46 = vpop.f32.mrf.mxu1 }
 0x3d5   : > { %v3121_v24 = vpop.f32.mrf.mxu1 }
 0x3d6   : > { %v1899_v13 = vadd.f32 %v3121_v24, %v3870_v43 }
 0x3d7   : > { %v1893_v10 = vpop.f32.mrf.mxu1 }
 0x3d8   : > { %v1894_v60 = vadd.f32 %v3870_v43, %v1893_v10  ;;  %v2173_v24 = vmax.f32 %v1899_v13, 0.0  ;;  %v1884_v10 = vadd.f32 %v3870_v43, %v3853_v46  ;;  %v1874_v46 = vadd.f32 %v3870_v43, %v3851_v37 }
 0x3d9   : > { %v3124_v21 = vpop.f32.mrf.mxu1 }
 0x3da   : > { %v1909_v58 = vadd.f32 %v3124_v21, %v3870_v43 }
 0x3db   : > { %v1903_v45 = vpop.f32.mrf.mxu1 }
 0x3dc   : > { %v1904_v63 = vadd.f32 %v3870_v43, %v1903_v45  ;;  %v2175_v56 = vmax.f32 %v1909_v58, 0.0 }
 0x3dd   : > { %v3127_v15 = vpop.f32.mrf.mxu1 }
 0x3de   : > { %v1919_v59 = vadd.f32 %v3127_v15, %v3870_v43  ;;  %v2174_v18 = vmax.f32 %v1904_v63, 0.0  ;;  %v1854_v63 = vadd.f32 %v3870_v43, %v3843_v41  ;;  %v1844_v41 = vadd.f32 %v3870_v43, %v3839_v52 }
 0x3df   : > { %v1913_v35 = vpop.f32.mrf.mxu1 }
 0x3e0   : > { %v1914_v53 = vadd.f32 %v3870_v43, %v1913_v35  ;;  %v2177_v31 = vmax.f32 %v1919_v59, 0.0  ;;  %v2172_v35 = vmax.f32 %v1894_v60, 0.0 }
 0x3e1   : > { %v3855_v39 = vpop.f32.mrf.mxu1 }
 0x3e2   : > { %v2176_v28 = vmax.f32 %v1914_v53, 0.0 }
 0x3e3   : > { %v3857_v47 = vpop.f32.mrf.mxu1 }
 0x3e5   : > { %v3859_v20 = vpop.f32.mrf.mxu1 }
 0x3e7   : > { %v3861_v7 = vpop.f32.mrf.mxu1 }
 0x3e9   : > { %v3863_v0 = vpop.f32.mrf.mxu1 }
 0x3eb   : > { %v3865_v48 = vpop.f32.mrf.mxu1 }
 0x3ed   : > { %v3139_v23 = vpop.f32.mrf.mxu1 }
 0x3ef   : > { %v1953_v36 = vpop.f32.mrf.mxu1 }
 0x3f1   : > { %v3142_v17 = vpop.f32.mrf.mxu1 }
 0x3f2   : > { %v1969_v49 = vadd.f32 %v3142_v17, %v3870_v43  ;;  %v1959_v17 = vadd.f32 %v3139_v23, %v3870_v43  ;;  %v1949_v23 = vadd.f32 %v3863_v0, %v3870_v43  ;;  %v1939_v0 = vadd.f32 %v3859_v20, %v3870_v43 }
 0x3f3   : > { %v1963_v8 = vpop.f32.mrf.mxu1  ;;  %v1929_v20 = vadd.f32 %v3855_v39, %v3870_v43 }
 0x3f4   : > { %v1964_v45 = vadd.f32 %v3870_v43, %v1963_v8  ;;  %v1954_v8 = vadd.f32 %v3870_v43, %v1953_v36  ;;  %v2185_v53 = vmax.f32 %v1959_v17, 0.0  ;;  %v1944_v36 = vadd.f32 %v3870_v43, %v3865_v48 }
 0x3f5   : > { %v3145_v50 = vpop.f32.mrf.mxu1  ;;  %v2183_v27 = vmax.f32 %v1949_v23, 0.0  ;;  %v1934_v48 = vadd.f32 %v3870_v43, %v3861_v7  ;;  %v1924_v7 = vadd.f32 %v3870_v43, %v3857_v47  ;;  %v2179_v39 = vmax.f32 %v1929_v20, 0.0 }
 0x3f6   : > { %v1979_v12 = vadd.f32 %v3145_v50, %v3870_v43  ;;  %v2186_v59 = vmax.f32 %v1964_v45, 0.0  ;;  %v2184_v37 = vmax.f32 %v1954_v8, 0.0 }
 0x3f7   : > { %v1973_v30 = vpop.f32.mrf.mxu1 }
 0x3f8   : > { %v1974_v29 = vadd.f32 %v3870_v43, %v1973_v30  ;;  %v2189_v11 = vmax.f32 %v1979_v12, 0.0  ;;  %v2187_v30 = vmax.f32 %v1969_v49, 0.0 }
 0x3f9   : > { %v3148_v51 = vpop.f32.mrf.mxu1 }
 0x3fa   : > { %v1989_v34 = vadd.f32 %v3148_v51, %v3870_v43  ;;  %v2188_v15 = vmax.f32 %v1974_v29, 0.0  ;;  %v2171_v51 = vmax.f32 %v1889_v9, 0.0  ;;  %v2180_v29 = vmax.f32 %v1934_v48, 0.0 }
 0x3fb   : > { %v1983_v33 = vpop.f32.mrf.mxu1 }
 0x3fc   : > { %v1984_v61 = vadd.f32 %v3870_v43, %v1983_v33  ;;  %v2191_v4 = vmax.f32 %v1989_v34, 0.0 }
 0x3fd   : > { %v3151_v2 = vpop.f32.mrf.mxu1 }
 0x3fe   : > { %v1999_v5 = vadd.f32 %v3151_v2, %v3870_v43  ;;  %v2190_v16 = vmax.f32 %v1984_v61, 0.0  ;;  %v2170_v2 = vmax.f32 %v1884_v10, 0.0  ;;  %v2167_v61 = vmax.f32 %v1869_v42, 0.0 }
 0x3ff   : > { %v1993_v55 = vpop.f32.mrf.mxu1 }
 0x400   : > { %v2193_v6 = vmax.f32 %v1999_v5, 0.0  ;;  %v1994_v57 = vadd.f32 %v3870_v43, %v1993_v55  ;;  %v2169_v55 = vmax.f32 %v1879_v44, 0.0 }
 0x401   : > { %v3878_v3 = vpop.f32.mrf.mxu1 }
 0x402   : > { %v2192_v62 = vmax.f32 %v1994_v57, 0.0  ;;  %2907 = vmatprep.subr.mxu1 %v2193_v6  ;;  %v1864_v6 = vadd.f32 %v3870_v43, %v3847_v38  ;;  %v2168_v57 = vmax.f32 %v1874_v46, 0.0  ;;  %v2182_v38 = vmax.f32 %v1944_v36, 0.0 }
 0x403   : > { %v3882_v32 = vpop.f32.mrf.mxu1  ;;  %2908 = vmatpush3.msra.mxu1 %v2177_v31  ;;  %v1859_v31 = vadd.f32 %v3841_v25, %v3870_v43  ;;  %v2181_v25 = vmax.f32 %v1939_v0, 0.0 }
 0x404   : > { %2909 = vmatprep.subr.mxu1 %v2192_v62 }
 0x405   : > { %v3886_v14 = vpop.f32.mrf.mxu1  ;;  %2910 = vmatpush3.msra.mxu1 %v2176_v28  ;;  %v2166_v28 = vmax.f32 %v1864_v6, 0.0  ;;  %v2165_v13 = vmax.f32 %v1859_v31, 0.0 }
 0x406   : > { %2911 = vmatprep.subr.mxu1 %v2191_v4  ;;  %v1849_v4 = vadd.f32 %v3836_v40, %v3870_v43  ;;  %v2178_v40 = vmax.f32 %v1924_v7, 0.0 }
 0x407   : > { %v3890_v1 = vpop.f32.mrf.mxu1  ;;  %2912 = vmatpush3.msra.mxu1 %v2175_v56 }
 0x408   : > { %2913 = vmatprep.subr.mxu1 %v2190_v16  ;;  %v2164_v16 = vmax.f32 %v1854_v63, 0.0 }
 0x409   : > { %v3894_v21 = vpop.f32.mrf.mxu1  ;;  %2914 = vmatpush3.msra.mxu1 %v2174_v18  ;;  %v2163_v18 = vmax.f32 %v1849_v4, 0.0 }
 0x40a   : > { %2915 = vmatprep.subr.mxu1 %v2189_v11  ;;  %v2162_v11 = vmax.f32 %v1844_v41, 0.0 }
 0x40b   : > { %v3899_v50 = vpop.f32.mrf.mxu1  ;;  %2916 = vmatpush3.msra.mxu1 %v2173_v24 }
 0x40c   : > { %2917 = vmatprep.subr.mxu1 %v2188_v15 }
 0x40d   : > { %v3904_v33 = vpop.f32.mrf.mxu1  ;;  %2918 = vmatpush3.msra.mxu1 %v2172_v35 }
 0x40e   : > { %2919 = vmatprep.subr.mxu1 %v2187_v30 }
 0x40f   : > { %v3909_v5 = vpop.f32.mrf.mxu1  ;;  %2920 = vmatpush3.msra.mxu1 %v2171_v51 }
 0x410   : > { %2921 = vmatprep.subr.mxu1 %v2186_v59 }
 0x411   : > { %v3915_v34 = vpop.f32.mrf.mxu1  ;;  %2922 = vmatpush3.msra.mxu1 %v2170_v2 }
 0x412   : > { %2923 = vmatprep.subr.mxu1 %v2185_v53 }
 0x413   : > { %v3921_v58 = vpop.f32.mrf.mxu1  ;;  %2924 = vmatpush3.msra.mxu1 %v2169_v55 }
 0x414   : > { %2925 = vmatprep.subr.mxu1 %v2184_v37 }
 0x415   : > { %v3927_v62 = vpop.f32.mrf.mxu1  ;;  %2926 = vmatpush3.msra.mxu1 %v2168_v57 }
 0x416   : > { %2927 = vmatprep.subr.mxu1 %v2183_v27  ;;  %v2059_v63 = vadd.f32 %v3927_v62, %v3870_v43 }
 0x417   : > { %v3933_v12 = vpop.f32.mrf.mxu1  ;;  %2928 = vmatpush3.msra.mxu1 %v2167_v61 }
 0x418   : > { %2929 = vmatprep.subr.mxu1 %v2182_v38  ;;  %v2054_v4 = vadd.f32 %v3870_v43, %v3933_v12  ;;  %v2205_v41 = vmax.f32 %v2059_v63, 0.0 }
 0x419   : > { %v3172_v56 = vpop.f32.mrf.mxu1  ;;  %2930 = vmatpush3.msra.mxu1 %v2166_v28 }
 0x41a   : > { %2931 = vmatprep.subr.mxu1 %v2181_v25  ;;  %v2069_v6 = vadd.f32 %v3172_v56, %v3870_v43 }
 0x41b   : > { %v2063_v60 = vpop.f32.mrf.mxu1  ;;  %2932 = vmatpush3.msra.mxu1 %v2165_v13 }
 0x41c   : > { %2933 = vmatprep.subr.mxu1 %v2180_v29  ;;  %v2064_v31 = vadd.f32 %v3870_v43, %v2063_v60  ;;  %v2207_v28 = vmax.f32 %v2069_v6, 0.0  ;;  %v2049_v29 = vadd.f32 %v3915_v34, %v3870_v43  ;;  %v2044_v60 = vadd.f32 %v3870_v43, %v3921_v58 }
 0x41d   : > { %v3175_v49 = vpop.f32.mrf.mxu1  ;;  %2934 = vmatpush3.msra.mxu1 %v2164_v16 }
 0x41e   : > { %2935 = vmatprep.subr.mxu1 %v2179_v39  ;;  %v2079_v2 = vadd.f32 %v3175_v49, %v3870_v43  ;;  %v2206_v13 = vmax.f32 %v2064_v31, 0.0  ;;  %v2204_v39 = vmax.f32 %v2054_v4, 0.0  ;;  %v2039_v49 = vadd.f32 %v3904_v33, %v3870_v43 }
 0x41f   : > { %v2073_v9 = vpop.f32.mrf.mxu1  ;;  %2936 = vmatpush3.msra.mxu1 %v2163_v18 }
 0x420   : > { %2937 = vmatprep.subr.mxu1 %v2178_v40  ;;  %v2074_v53 = vadd.f32 %v3870_v43, %v2073_v9  ;;  %v2209_v57 = vmax.f32 %v2079_v2, 0.0  ;;  %v2203_v40 = vmax.f32 %v2049_v29, 0.0  ;;  %v2034_v9 = vadd.f32 %v3870_v43, %v3909_v5 }
 0x421   : > { %v3943_v47 = vpop.f32.mrf.mxu1  ;;  %2938 = vmatpush3.msra.mxu1 %v2162_v11 }
 0x422   : > { %2291 = vmatmul.mubr.f32.vlgmr.msra.gmra.mxu1 %v3482_v22  ;;  %v2208_v61 = vmax.f32 %v2074_v53, 0.0  ;;  %v2200_v5 = vmax.f32 %v2034_v9, 0.0 }
 0x423   : > { %v3946_v52 = vpop.f32.mrf.mxu1 }
 0x425   : > { %v3948_v24 = vpop.f32.mrf.mxu1 }
 0x427   : > { %v3950_v45 = vpop.f32.mrf.mxu1 }
 0x429   : > { %v3184_v15 = vpop.f32.mrf.mxu1 }
 0x42a   : > { %v2109_v58 = vadd.f32 %v3184_v15, %v3870_v43  ;;  %v2099_v15 = vadd.f32 %v3948_v24, %v3870_v43  ;;  %v2089_v24 = vadd.f32 %v3943_v47, %v3870_v43 }
 0x42b   : > { %v3952_v10 = vpop.f32.mrf.mxu1 }
 0x42c   : > { %v2104_v33 = vadd.f32 %v3870_v43, %v3952_v10  ;;  %v2094_v10 = vadd.f32 %v3870_v43, %v3950_v45  ;;  %v2084_v45 = vadd.f32 %v3870_v43, %v3946_v52 }
 0x42d   : > { %v3187_v35 = vpop.f32.mrf.mxu1 }
 0x42e   : > { %v2119_v12 = vadd.f32 %v3187_v35, %v3870_v43  ;;  %v2029_v35 = vadd.f32 %v3894_v21, %v3870_v43  ;;  %v2019_v21 = vadd.f32 %v3886_v14, %v3870_v43  ;;  %v2214_v2 = vmax.f32 %v2104_v33, 0.0 }
 0x42f   : > { %v2113_v17 = vpop.f32.mrf.mxu1  ;;  %v2009_v14 = vadd.f32 %v3878_v3, %v3870_v43  ;;  %v2368_v3 = vld [vmem:[%s4047_s11 + $0x10] sm:$0xff] }
 0x430   : > { %v2114_v34 = vadd.f32 %v3870_v43, %v2113_v17  ;;  %v2197_v53 = vmax.f32 %v2019_v21, 0.0 }
 0x431   : > { %v3190_v30 = vpop.f32.mrf.mxu1  ;;  %v2195_v47 = vmax.f32 %v2009_v14, 0.0 }
 0x432   : > { %v2129_v56 = vadd.f32 %v3190_v30, %v3870_v43  ;;  %v2202_v30 = vmax.f32 %v2044_v60, 0.0  ;;  %v2216_v17 = vmax.f32 %v2114_v34, 0.0 }
 0x433   : > { %v2123_v44 = vpop.f32.mrf.mxu1 }
 0x434   : > { %v2124_v62 = vadd.f32 %v3870_v43, %v2123_v44  ;;  %v2219_v18 = vmax.f32 %v2129_v56, 0.0  ;;  %v2217_v44 = vmax.f32 %v2119_v12, 0.0 }
 0x435   : > { %v3193_v51 = vpop.f32.mrf.mxu1 }
 0x436   : > { %v2139_v48 = vadd.f32 %v3193_v51, %v3870_v43  ;;  %v2218_v11 = vmax.f32 %v2124_v62, 0.0  ;;  %v2201_v51 = vmax.f32 %v2039_v49, 0.0 }
 0x437   : > { %v2133_v8 = vpop.f32.mrf.mxu1 }
 0x438   : > { %v2134_v20 = vadd.f32 %v3870_v43, %v2133_v8  ;;  %v2221_v7 = vmax.f32 %v2139_v48, 0.0  ;;  %v2024_v8 = vadd.f32 %v3870_v43, %v3899_v50  ;;  %v2014_v50 = vadd.f32 %v3870_v43, %v3890_v1 }
 0x439   : > { %v3196_v59 = vpop.f32.mrf.mxu1  ;;  %v2004_v1 = vadd.f32 %v3870_v43, %v3882_v32  ;;  %v2366_v32 = vld [vmem:[%s4047_s11] sm:$0xff] }
 0x43a   : > { %v2149_v55 = vadd.f32 %v3196_v59, %v3870_v43  ;;  %v2220_v16 = vmax.f32 %v2134_v20, 0.0  ;;  %v2215_v59 = vmax.f32 %v2109_v58, 0.0 }
 0x43b   : > { %v2143_v46 = vpop.f32.mrf.mxu1  ;;  %v2194_v6 = vmax.f32 %v2004_v1, 0.0 }
 0x43c   : > { %v2144_v0 = vadd.f32 %v3870_v43, %v2143_v46  ;;  %v2223_v38 = vmax.f32 %v2149_v55, 0.0  ;;  %v2199_v46 = vmax.f32 %v2029_v35, 0.0  ;;  %v2196_v55 = vmax.f32 %v2014_v50, 0.0 }
 0x43d   : > { %v3199_v22 = vpop.f32.mrf.mxu1 }
 0x43e   : > { %v2159_v23 = vadd.f32 %v3199_v22, %v3870_v43  ;;  %v2222_v25 = vmax.f32 %v2144_v0, 0.0  ;;  %v2198_v22 = vmax.f32 %v2024_v8, 0.0 }
 0x43f   : > { %v2153_v42 = vpop.f32.mrf.mxu1 }
 0x440   : > { %v2225_v36 = vmax.f32 %v2159_v23, 0.0  ;;  %v2154_v37 = vadd.f32 %v3870_v43, %v2153_v42  ;;  %v2213_v23 = vmax.f32 %v2099_v15, 0.0  ;;  %v2212_v42 = vmax.f32 %v2094_v10, 0.0  ;;  %v2369_v43 = vld [vmem:[%s4047_s11 + $0x18] sm:$0xff] }
 0x442   : > { %v2224_v27 = vmax.f32 %v2154_v37, 0.0  ;;  %2942 = vmatprep.subr.mxu0 %v2225_v36  ;;  %v2211_v36 = vmax.f32 %v2089_v24, 0.0  ;;  %v2210_v37 = vmax.f32 %v2084_v45, 0.0 }
 0x443   : > { %2943 = vmatpush3.msra.mxu0 %v2209_v57 }
 0x444   : > { %2944 = vmatprep.subr.mxu0 %v2224_v27 }
 0x445   : > { %2945 = vmatpush3.msra.mxu0 %v2208_v61 }
 0x446   : > { %2946 = vmatprep.subr.mxu0 %v2223_v38  ;;  %v2691_v38 = vld [vmem:[%s4048_s12] ss:$0 sm:$0xff] }
 0x447   : > { %2947 = vmatpush3.msra.mxu0 %v2207_v28 }
 0x448   : > { %2948 = vmatprep.subr.mxu0 %v2222_v25 }
 0x449   : > { %2949 = vmatpush3.msra.mxu0 %v2206_v13 }
 0x44a   : > { %2950 = vmatprep.subr.mxu0 %v2221_v7 }
 0x44b   : > { %2951 = vmatpush3.msra.mxu0 %v2205_v41 }
 0x44c   : > { %2952 = vmatprep.subr.mxu0 %v2220_v16  ;;  %v2454_v4 = vpop.xlane.xlu0 %2453 }
 0x44d   : > { %2953 = vmatpush3.msra.mxu0 %v2204_v39  ;;  %v2455_v13 = vmax.f32 %v2454_v4, 1e-24 }
 0x44e   : > { %2954 = vmatprep.subr.mxu0 %v2219_v18 }
 0x44f   : > { %2955 = vmatpush3.msra.mxu0 %v2203_v40  ;;  %3223 = vrsqrt.f32 %v2455_v13 }
 0x450   : > { %2956 = vmatprep.subr.mxu0 %v2218_v11 }
 0x451   : > { %2957 = vmatpush3.msra.mxu0 %v2202_v30 }
 0x452   : > { %2958 = vmatprep.subr.mxu0 %v2217_v44 }
 0x453   : > { %2959 = vmatpush3.msra.mxu0 %v2201_v51 }
 0x454   : > { %2960 = vmatprep.subr.mxu0 %v2216_v17 }
 0x455   : > { %2961 = vmatpush3.msra.mxu0 %v2200_v5 }
 0x456   : > { %2962 = vmatprep.subr.mxu0 %v2215_v59 }
 0x457   : > { %2963 = vmatpush3.msra.mxu0 %v2199_v46 }
 0x458   : > { %2964 = vmatprep.subr.mxu0 %v2214_v2 }
 0x459   : > { %2965 = vmatpush3.msra.mxu0 %v2198_v22 }
 0x45a   : > { %2966 = vmatprep.subr.mxu0 %v2213_v23 }
 0x45b   : > { %2967 = vmatpush3.msra.mxu0 %v2197_v53 }
 0x45c   : > { %2968 = vmatprep.subr.mxu0 %v2212_v42  ;;  %v3224_v29 = vpop.eup %3223 }
 0x45d   : > { %2969 = vmatpush3.msra.mxu0 %v2196_v55  ;;  %v2457_v62 = vmul.f32 %v3224_v29, %v3832_v19 }
 0x45e   : > { %2970 = vmatprep.subr.mxu0 %v2211_v36 }
 0x45f   : > { %2971 = vmatpush3.msra.mxu0 %v2195_v47 }
 0x460   : > { %2972 = vmatprep.subr.mxu0 %v2210_v37 }
 0x461   : > { %2973 = vmatpush3.msra.mxu0 %v2194_v6 }
 0x462   : > { %2361 = vmatmul.mubr.f32.vlgmr.msra.gmra.mxu0 %v3488_v26  ;;  %3200 = vmatprep.subr.mxu0 %v3236_v54  ;;  %v2367_v26 = vld [vmem:[%s4047_s11 + $0x8] sm:$0xff] }
 0x463   : > { %3208 = vmatprep.mubr.msk.f32.mxu0 %vm3237_vm2, %v3236_v54  ;;  %3201 = vmatpush3.msra.mxu0 %v2369_v43 }
 0x464   : > { %3202 = vmatprep.subr.mxu0 %v3236_v54 }
 0x465   : > { %3203 = vmatpush3.msra.mxu0 %v2368_v3 }
 0x466   : > { %3204 = vmatprep.subr.mxu0 %v3236_v54 }
 0x467   : > { %3205 = vmatpush3.msra.mxu0 %v2367_v26 }
 0x468   : > { %3206 = vmatprep.subr.mxu0 %v3236_v54 }
 0x469   : > { %3207 = vmatpush3.msra.mxu0 %v2366_v32 }
 0x4e2   : > { %v2939_v52 = vpop.f32.mrf.mxu1 }
 0x4e4   : > { %v2940_v0 = vpop.f32.mrf.mxu1 }
 0x4e5   : > { %v2941_v31 = vadd.f32 %v2940_v0, %v2939_v52 }
 0x522   : > { %v2974_v57 = vpop.f32.mrf.mxu0 }
 0x524   : > { %v2975_v27 = vpop.f32.mrf.mxu0 }
 0x525   : > { %v2976_v61 = vadd.f32 %v2975_v27, %v2974_v57 }
 0x527   : > { %v2363_v48 = vadd.f32 %v2976_v61, %v2941_v31 }
 0x529   : > { %3209 = vmatmul.mubr.msk.f32.vlgmr.msra.gmra.mxu0 %vm1415_vm3, %v2363_v48 }
 0x5e9   : > { %v2446_v63 = vpop.f32.mrf.mxu0 }
 0x5ea   : > { %v2447_v54 = vadd.f32 %v2691_v38, %v2446_v63 }
 0x5eb   : > { %v3210_v28 = vpop.f32.mrf.mxu0 }
 0x5ec   : > { %v2458_v20 = vmul.f32 %v2447_v54, %v2447_v54 }
 0x5ee   : > { %v2459_v25 = vsel %vm2451_vm4, %v2458_v20, 0.0 }
 0x5ef   : > { %2460 = vadd.xlane.f32.xlu0 %v2459_v25 }
 0x678   : > { %v2461_v56 = vpop.xlane.xlu0 %2460 }
 0x679   : > { %v2462_v7 = vmax.f32 %v2461_v56, 1e-24 }
 0x67b   : > { %3225 = vrsqrt.f32 %v2462_v7 }
 0x688   : > { %v3226_v41 = vpop.eup %3225 }
 0x689   : > { %v2464_v16 = vmul.f32 %v3226_v41, %v2447_v54 }
 0x68b   : > { %v2465_v60 = vmul.f32 %v2464_v16, %v2457_v62 }
 0x68d   : > { %v2466_v39 = vsel %vm2451_vm4, %v2465_v60, 0.0 }
 0x68e   : > { %2467 = vadd.xlane.f32.xlu1 %v2466_v39 }
 0x717   : > { %v2468_v12 = vpop.xlane.xlu1 %2467 }
 0x718   : > { %v2470_v18 = vsel %vm2469_vm5, %v2468_v12, 0.0 }
 0x719   : > { %v2471_v49 = vrot.slane %v2470_v18, 4 }
 0x71b   : > { %v2472_v40 = vadd.f32 %v2471_v49, %v2470_v18 }
 0x71d   : > { %v2473_v34 = vrot.slane %v2472_v40, 2 }
 0x71f   : > { %v2474_v11 = vadd.f32 %v2473_v34, %v2472_v40 }
 0x721   : > { %v2475_v9 = vrot.slane %v2474_v11, 1 }
 0x723   : > { %v2476_v30 = vadd.f32 %v2475_v9, %v2474_v11 }
 0x725   : > { %v2477_v58 = vsub.f32 0.0, %v2476_v30 }
 0x727   : > { %v2478_v19 = vmul.f32 0.25, %v2477_v58 }
 0x729   : > { %2479 = vst [vmem:[%s458_s16] sm:$0xff] %v2478_v19 }
 0x72a PF: > { %s23_s25 = sadd.s32 1, %s3233_s25  }
 0x72b   : > { %p20_p4 = scmp.ge.s32.totalorder %s23_s25, 4  }
 0x72d   :  { %22 = sbr.rel (!%p20_p4) target bundleno = 1 (0x1), region = 105 }

</bundles_post_ra>
